<compile_context>
chip_gen: v6e
topology: v6e:2x2x1
jax: 0.10.0
libtpu: 0.0.40
codegen_flags: <defaults>
</compile_context>

<pallas_src>
import functools
import math

import jax
import jax.numpy as jnp
import numpy as np
from jax.experimental import pallas as pl
from jax.experimental.pallas import tpu as pltpu

# Small shapes consistent with the module structure (pose/audio/d_model scaled down).
POSE_DIM = 32
AUDIO_DIM = 48
IN_DIM = POSE_DIM + AUDIO_DIM
IN_PAD = 128           # lane-dense padded input width  (>= IN_DIM, multiple of 128)
D_MODEL = 64
N_HEADS = 4
N_LAYERS = 2
MAX_SEQ = 8
HEAD_DIM = D_MODEL // N_HEADS
OUT_PAD = 128          # lane-dense padded output width (>= POSE_DIM, multiple of 128)
LN_EPS = 1e-5          # nn.LayerNorm default


def _layernorm(x, gamma, beta):
    # Single-pass moments: sum(x) and sum(x*x) are independent reductions
    # (var = E[x^2] - E[x]^2), so the two XLU reductions have no serial dependency.
    inv_d = 1.0 / D_MODEL
    mean = jnp.sum(x, axis=-1, keepdims=True) * inv_d
    mean_sq = jnp.sum(x * x, axis=-1, keepdims=True) * inv_d
    var = jnp.maximum(mean_sq - mean * mean, 0.0)
    return (x - mean) * jax.lax.rsqrt(var + LN_EPS) * gamma + beta


def _denoise_kernel(*args, has_mask):
    """One grid step: a slab of bb*T rows fully resident in VMEM."""
    if has_mask:
        (xa_ref, bias0_ref, w_in_ref, w_qkv_ref, b_qkv_ref, w_o_ref, b_o_ref,
         w_ffn_ref, b_ffn_ref, ln_ref, w_out_ref, b_out_ref, mask_ref, o_ref) = args
    else:
        (xa_ref, bias0_ref, w_in_ref, w_qkv_ref, b_qkv_ref, w_o_ref, b_o_ref,
         w_ffn_ref, b_ffn_ref, ln_ref, w_out_ref, b_out_ref, o_ref) = args
        mask_ref = None

    # Fused input projection (bf16 MXU operands, lane-dense 128-wide contraction)
    # + folded (pos_embed + proj biases + time-embedding) per-row bias (f32).
    h = jnp.dot(xa_ref[...], w_in_ref[...],
                preferred_element_type=jnp.float32) + bias0_ref[...]          # (M, D) f32

    scale = 1.0 / math.sqrt(HEAD_DIM)
    nt = (((1,), (1,)), ((), ()))   # q @ k^T : contract last dims, no batch dims

    for l in range(N_LAYERS):
        # --- self-attention block (post-LN, dropout = identity in eval mode) ---
        qkv = jnp.dot(h.astype(jnp.bfloat16), w_qkv_ref[l],
                      preferred_element_type=jnp.float32) + b_qkv_ref[l]      # (M, 3*D) f32

        head_outs = []
        for hh in range(N_HEADS):
            q = qkv[:, hh * HEAD_DIM:(hh + 1) * HEAD_DIM]
            k = qkv[:, D_MODEL + hh * HEAD_DIM:D_MODEL + (hh + 1) * HEAD_DIM]
            v = qkv[:, 2 * D_MODEL + hh * HEAD_DIM:2 * D_MODEL + (hh + 1) * HEAD_DIM]

            s = jax.lax.dot_general((q * scale).astype(jnp.bfloat16),
                                    k.astype(jnp.bfloat16), nt,
                                    preferred_element_type=jnp.float32)       # (M, M) f32
            if mask_ref is not None:
                s = s + mask_ref[...]          # block-diagonal bias, precomputed host-side
            s = s - jnp.max(s, axis=-1, keepdims=True)
            p = jnp.exp(s)
            p = p * pl.reciprocal(jnp.sum(p, axis=-1, keepdims=True), approx=True)
            head_outs.append(jnp.dot(p.astype(jnp.bfloat16), v.astype(jnp.bfloat16),
                                     preferred_element_type=jnp.float32))     # (M, Dh)

        # lane-concat heads, then one wide output projection per layer
        attn_cat = jnp.concatenate(head_outs, axis=-1).astype(jnp.bfloat16)   # (M, D)
        attn = jnp.dot(attn_cat, w_o_ref[l],
                       preferred_element_type=jnp.float32) + b_o_ref[l]
        h = _layernorm(h + attn, ln_ref[4 * l + 0], ln_ref[4 * l + 1])

        # --- feed-forward block (dim_feedforward == d_model, ReLU) ---
        f = jnp.dot(h.astype(jnp.bfloat16), w_ffn_ref[2 * l],
                    preferred_element_type=jnp.float32) + b_ffn_ref[2 * l]
        f = jnp.maximum(f, 0.0)
        f = jnp.dot(f.astype(jnp.bfloat16), w_ffn_ref[2 * l + 1],
                    preferred_element_type=jnp.float32) + b_ffn_ref[2 * l + 1]
        h = _layernorm(h + f, ln_ref[4 * l + 2], ln_ref[4 * l + 3])

    # output_proj (padded to 128 lanes for a dense, unmasked store)
    o_ref[...] = jnp.dot(h.astype(jnp.bfloat16), w_out_ref[...],
                         preferred_element_type=jnp.float32) + b_out_ref[...]


def init_params(key):
    def normal(k, shape, scale):
        return scale * jax.random.normal(k, shape, dtype=jnp.float32)

    ks = iter(jax.random.split(key, 40))
    s = 1.0 / math.sqrt(D_MODEL)
    p = {}
    p['wp'] = normal(next(ks), (POSE_DIM, D_MODEL), 1.0 / math.sqrt(POSE_DIM))
    p['bp'] = normal(next(ks), (1, D_MODEL), 0.02)
    p['wa'] = normal(next(ks), (AUDIO_DIM, D_MODEL), 1.0 / math.sqrt(AUDIO_DIM))
    p['ba'] = normal(next(ks), (1, D_MODEL), 0.02)
    p['pos'] = normal(next(ks), (MAX_SEQ, D_MODEL), 0.5)
    p['wt1'] = normal(next(ks), (1, D_MODEL), 1.0)
    p['bt1'] = normal(next(ks), (1, D_MODEL), 0.02)
    p['wt2'] = normal(next(ks), (D_MODEL, D_MODEL), s)
    p['bt2'] = normal(next(ks), (1, D_MODEL), 0.02)
    # per-head attention parameters
    p['wq'] = normal(next(ks), (N_LAYERS, N_HEADS, D_MODEL, HEAD_DIM), s)
    p['wk'] = normal(next(ks), (N_LAYERS, N_HEADS, D_MODEL, HEAD_DIM), s)
    p['wv'] = normal(next(ks), (N_LAYERS, N_HEADS, D_MODEL, HEAD_DIM), s)
    p['bq'] = normal(next(ks), (N_LAYERS, N_HEADS, 1, HEAD_DIM), 0.02)
    p['bk'] = normal(next(ks), (N_LAYERS, N_HEADS, 1, HEAD_DIM), 0.02)
    p['bv'] = normal(next(ks), (N_LAYERS, N_HEADS, 1, HEAD_DIM), 0.02)
    p['wo'] = normal(next(ks), (N_LAYERS, N_HEADS, HEAD_DIM, D_MODEL), s)
    p['bo'] = normal(next(ks), (N_LAYERS, 1, D_MODEL), 0.02)
    # FFN + LayerNorms
    p['w1'] = normal(next(ks), (N_LAYERS, D_MODEL, D_MODEL), s)
    p['b1'] = normal(next(ks), (N_LAYERS, 1, D_MODEL), 0.02)
    p['w2'] = normal(next(ks), (N_LAYERS, D_MODEL, D_MODEL), s)
    p['b2'] = normal(next(ks), (N_LAYERS, 1, D_MODEL), 0.02)
    p['ln1g'] = 1.0 + normal(next(ks), (N_LAYERS, 1, D_MODEL), 0.1)
    p['ln1b'] = normal(next(ks), (N_LAYERS, 1, D_MODEL), 0.02)
    p['ln2g'] = 1.0 + normal(next(ks), (N_LAYERS, 1, D_MODEL), 0.1)
    p['ln2b'] = normal(next(ks), (N_LAYERS, 1, D_MODEL), 0.02)
    p['wout'] = normal(next(ks), (D_MODEL, POSE_DIM), s)
    p['bout'] = normal(next(ks), (1, POSE_DIM), 0.02)
    return p


def _pack_operands(params, x_t, audio, t):
    """Host-side packing: few, contiguous, leading-axis-indexed operands.

    Weights are pre-cast to bf16 (MXU-native); biases / additive terms stay f32 so all
    elementwise, softmax and LayerNorm math stays in f32.
    """
    B, T, _ = x_t.shape
    L, H, D, Dh = N_LAYERS, N_HEADS, D_MODEL, HEAD_DIM

    # activation slab: pose || audio, zero-padded 80 -> 128 lanes, bf16 MXU operand
    xa = jnp.concatenate([x_t, audio], axis=-1).reshape(B * T, IN_DIM)
    xa = jnp.pad(xa, ((0, 0), (0, IN_PAD - IN_DIM))).astype(jnp.bfloat16)
    w_in = jnp.concatenate([params['wp'], params['wa']], axis=0)             # (80, D)
    w_in = jnp.pad(w_in, ((0, IN_PAD - IN_DIM), (0, 0))).astype(jnp.bfloat16)

    # time-embedding MLP hoisted to the wrapper; folded together with pos_embed and
    # the two projection biases into one per-row additive term (f32).
    tv = (t.astype(jnp.float32) / 1000.0).reshape(B, 1)
    te = jnp.maximum(tv @ params['wt1'] + params['bt1'], 0.0) @ params['wt2'] + params['bt2']
    bias0 = ((params['bp'] + params['ba'])[None]
             + params['pos'][:T][None]
             + te[:, None, :]).reshape(B * T, D)

    # fused per-layer QKV weight: (L, D, 3*H*Dh) with lane layout [Q heads | K heads | V heads]
    def heads_to_lanes(w):            # (L, H, D, Dh) -> (L, D, H*Dh)
        return w.transpose(0, 2, 1, 3).reshape(L, D, H * Dh)

    def bias_to_lanes(b):             # (L, H, 1, Dh) -> (L, 1, H*Dh)
        return b.transpose(0, 2, 1, 3).reshape(L, 1, H * Dh)

    w_qkv = jnp.concatenate([heads_to_lanes(params['wq']),
                             heads_to_lanes(params['wk']),
                             heads_to_lanes(params['wv'])], axis=-1).astype(jnp.bfloat16)
    b_qkv = jnp.concatenate([bias_to_lanes(params['bq']),
                             bias_to_lanes(params['bk']),
                             bias_to_lanes(params['bv'])], axis=-1)          # (L,1,192) f32

    # output projection applied to the lane-concatenated head outputs: (L, D, D)
    w_o = params['wo'].reshape(L, H * Dh, D).astype(jnp.bfloat16)
    b_o = params['bo']                                                       # (L, 1, D)

    w_ffn = jnp.stack([params['w1'], params['w2']],
                      axis=1).reshape(L * 2, D, D).astype(jnp.bfloat16)
    b_ffn = jnp.stack([params['b1'], params['b2']], axis=1).reshape(L * 2, 1, D)
    ln = jnp.stack([params['ln1g'], params['ln1b'],
                    params['ln2g'], params['ln2b']], axis=1).reshape(L * 4, 1, D)

    w_out = jnp.pad(params['wout'], ((0, 0), (0, OUT_PAD - POSE_DIM))).astype(jnp.bfloat16)
    b_out = jnp.pad(params['bout'], ((0, 0), (0, OUT_PAD - POSE_DIM)))
    return (xa, bias0, w_in, w_qkv, b_qkv, w_o, b_o, w_ffn, b_ffn, ln, w_out, b_out)


@functools.partial(jax.jit, static_argnames=("num_batch_blocks",))
def denoise_transformer(params, x_t, audio, t, num_batch_blocks=None):
    B, T, _ = x_t.shape
    if num_batch_blocks is None:
        # Default is a SINGLE grid step: v5e/v6e have one TensorCore (a second grid step
        # is pure per-step overhead + duplicated weight DMAs), and on v7x the megacore
        # split only pays once each block carries >= ~128 rows of work.
        num_batch_blocks = 2 if (B % 2 == 0 and ((B // 2) * T) % 8 == 0
                                 and (B // 2) * T >= 128) else 1
    assert B % num_batch_blocks == 0
    bb = B // num_batch_blocks
    m = bb * T
    assert num_batch_blocks == 1 or m % 8 == 0

    operands = list(_pack_operands(params, x_t, audio, t))

    has_mask = bb > 1
    if has_mask:
        # Block-diagonal additive mask precomputed host-side (keeps attention within
        # each sequence when one grid step carries several batch elements).
        rb = jnp.arange(m, dtype=jnp.int32) // T
        operands.append(
            jnp.where(rb[:, None] == rb[None, :], 0.0, -1e30).astype(jnp.float32))

    def row_spec(cols):
        return pl.BlockSpec((m, cols), lambda i: (i, 0))

    def full_spec(arr):
        if arr.ndim == 2:
            return pl.BlockSpec(arr.shape, lambda i: (0, 0))
        assert arr.ndim == 3
        return pl.BlockSpec(arr.shape, lambda i: (0, 0, 0))

    in_specs = ([row_spec(IN_PAD), row_spec(D_MODEL)]
                + [full_spec(a) for a in operands[2:]])
    out_spec = pl.BlockSpec((m, OUT_PAD), lambda i: (i, 0))

    kernel = functools.partial(_denoise_kernel, has_mask=has_mask)
    out = pl.pallas_call(
        kernel,
        out_shape=jax.ShapeDtypeStruct((B * T, OUT_PAD), jnp.float32),
        grid_spec=pltpu.PrefetchScalarGridSpec(
            num_scalar_prefetch=0,
            grid=(num_batch_blocks,),
            in_specs=in_specs,
            out_specs=out_spec,
        ),
        compiler_params=pltpu.CompilerParams(dimension_semantics=("parallel",)),
    )(*operands)
    return out[:, :POSE_DIM].reshape(B, T, POSE_DIM)


def reference(params, x_t, audio, t):
    """Pure-JAX f32 mirror of the PyTorch forward (eval mode), using the same params."""
    B, T, _ = x_t.shape
    tv = (t.astype(jnp.float32) / 1000.0).reshape(B, 1)
    h = (x_t @ params['wp'] + params['bp']
         + audio @ params['wa'] + params['ba']
         + params['pos'][:T][None])
    te = jnp.maximum(tv @ params['wt1'] + params['bt1'], 0.0) @ params['wt2'] + params['bt2']
    h = h + te[:, None, :]

    def ln(x, g, b):
        mu = x.mean(-1, keepdims=True)
        var = ((x - mu) ** 2).mean(-1, keepdims=True)
        return (x - mu) / jnp.sqrt(var + LN_EPS) * g + b

    scale = 1.0 / math.sqrt(HEAD_DIM)
    for l in range(N_LAYERS):
        attn = 0.0
        for hh in range(N_HEADS):
            q = h @ params['wq'][l, hh] + params['bq'][l, hh]
            k = h @ params['wk'][l, hh] + params['bk'][l, hh]
            v = h @ params['wv'][l, hh] + params['bv'][l, hh]
            s = jnp.einsum('btd,bsd->bts', q * scale, k)
            p = jax.nn.softmax(s, axis=-1)
            o = jnp.einsum('bts,bsd->btd', p, v)
            attn = attn + o @ params['wo'][l, hh]
        attn = attn + params['bo'][l]
        h = ln(h + attn, params['ln1g'][l], params['ln1b'][l])
        f = (jnp.maximum(h @ params['w1'][l] + params['b1'][l], 0.0)
             @ params['w2'][l] + params['b2'][l])
        h = ln(h + f, params['ln2g'][l], params['ln2b'][l])
    return h @ params['wout'] + params['bout']


if __name__ == "__main__":
    key = jax.random.PRNGKey(0)
    kp, kx, ka, kt = jax.random.split(key, 4)
    params = init_params(kp)

    B, T = 2, 8
    x_t = jax.random.normal(kx, (B, T, POSE_DIM), jnp.float32)
    audio = jax.random.normal(ka, (B, T, AUDIO_DIM), jnp.float32)
    t = jax.random.randint(kt, (B,), 0, 1000)

    ref = reference(params, x_t, audio, t)
    out = jax.block_until_ready(denoise_transformer(params, x_t, audio, t))
    assert out.shape == (B, T, POSE_DIM)
    # bf16 MXU operands (per perf review) => tolerance looser than a pure-f32 kernel;
    # softmax/LN/bias math stays f32 so structure errors would be O(1), not O(1e-2).
    np.testing.assert_allclose(np.asarray(out), np.asarray(ref), atol=1e-1, rtol=1e-1)

    # Exercise the multi-step path (grid=2) together with the host-precomputed
    # block-diagonal attention mask (bb=2 sequences per grid step).
    B2 = 4
    kx2, ka2, kt2 = jax.random.split(jax.random.PRNGKey(1), 3)
    x2 = jax.random.normal(kx2, (B2, T, POSE_DIM), jnp.float32)
    a2 = jax.random.normal(ka2, (B2, T, AUDIO_DIM), jnp.float32)
    t2 = jax.random.randint(kt2, (B2,), 0, 1000)
    ref2 = reference(params, x2, a2, t2)
    out2 = jax.block_until_ready(
        denoise_transformer(params, x2, a2, t2, num_batch_blocks=2))
    np.testing.assert_allclose(np.asarray(out2), np.asarray(ref2), atol=1e-1, rtol=1e-1)

    print("KERNEL_OK")
</pallas_src>

<mosaic_0001>
module attributes {stable_mosaic.version = 11 : i64} {
  func.func @_denoise_kernel(%arg0: i32, %arg1: memref<16x128xbf16, #tpu.memory_space<vmem>>, %arg2: memref<16x64xf32, #tpu.memory_space<vmem>>, %arg3: memref<128x64xbf16, #tpu.memory_space<vmem>>, %arg4: memref<2x64x192xbf16, #tpu.memory_space<vmem>>, %arg5: memref<2x1x192xf32, #tpu.memory_space<vmem>>, %arg6: memref<2x64x64xbf16, #tpu.memory_space<vmem>>, %arg7: memref<2x1x64xf32, #tpu.memory_space<vmem>>, %arg8: memref<4x64x64xbf16, #tpu.memory_space<vmem>>, %arg9: memref<4x1x64xf32, #tpu.memory_space<vmem>>, %arg10: memref<8x1x64xf32, #tpu.memory_space<vmem>>, %arg11: memref<64x128xbf16, #tpu.memory_space<vmem>>, %arg12: memref<1x128xf32, #tpu.memory_space<vmem>>, %arg13: memref<16x16xf32, #tpu.memory_space<vmem>>, %arg14: memref<16x128xf32, #tpu.memory_space<vmem>>) attributes {dimension_semantics = [#tpu.dimension_semantics<parallel>], iteration_bounds = array<i64: 1>, scalar_prefetch = 0 : i64, scratch_operands = 0 : i64, tpu.core_type = #tpu.core_type<tc>, window_params = [{transform_indices = @transform_0, window_bounds = array<i64: 16, 128>}, {transform_indices = @transform_1, window_bounds = array<i64: 16, 64>}, {pipeline_mode = #tpu.pipeline_mode<synchronous>, transform_indices = @transform_2, window_bounds = array<i64: 128, 64>}, {pipeline_mode = #tpu.pipeline_mode<synchronous>, transform_indices = @transform_3, window_bounds = array<i64: 2, 64, 192>}, {pipeline_mode = #tpu.pipeline_mode<synchronous>, transform_indices = @transform_4, window_bounds = array<i64: 2, 1, 192>}, {pipeline_mode = #tpu.pipeline_mode<synchronous>, transform_indices = @transform_5, window_bounds = array<i64: 2, 64, 64>}, {pipeline_mode = #tpu.pipeline_mode<synchronous>, transform_indices = @transform_6, window_bounds = array<i64: 2, 1, 64>}, {pipeline_mode = #tpu.pipeline_mode<synchronous>, transform_indices = @transform_7, window_bounds = array<i64: 4, 64, 64>}, {pipeline_mode = #tpu.pipeline_mode<synchronous>, transform_indices = @transform_8, window_bounds = array<i64: 4, 1, 64>}, {pipeline_mode = #tpu.pipeline_mode<synchronous>, transform_indices = @transform_9, window_bounds = array<i64: 8, 1, 64>}, {pipeline_mode = #tpu.pipeline_mode<synchronous>, transform_indices = @transform_10, window_bounds = array<i64: 64, 128>}, {pipeline_mode = #tpu.pipeline_mode<synchronous>, transform_indices = @transform_11, window_bounds = array<i64: 1, 128>}, {pipeline_mode = #tpu.pipeline_mode<synchronous>, transform_indices = @transform_12, window_bounds = array<i64: 16, 16>}, {transform_indices = @transform_13, window_bounds = array<i64: 16, 128>}]} {
    %c0 = arith.constant 0 : index
    %c0_0 = arith.constant 0 : index
    %0 = vector.load %arg1[%c0, %c0_0] : memref<16x128xbf16, #tpu.memory_space<vmem>>, vector<16x128xbf16>
    %c0_1 = arith.constant 0 : index
    %c0_2 = arith.constant 0 : index
    %1 = vector.load %arg3[%c0_1, %c0_2] : memref<128x64xbf16, #tpu.memory_space<vmem>>, vector<128x64xbf16>
    %cst = arith.constant dense<0.000000e+00> : vector<16x64xf32>
    %2 = tpu.matmul %0, %1, %cst {dimension_numbers = #tpu.dot_dimension_numbers<[1], [0], [0], [1], [0, 0, 1, 1], [], []>} : vector<16x128xbf16>, vector<128x64xbf16>, vector<16x64xf32> -> vector<16x64xf32>
    %c0_3 = arith.constant 0 : index
    %c0_4 = arith.constant 0 : index
    %3 = vector.load %arg2[%c0_3, %c0_4] : memref<16x64xf32, #tpu.memory_space<vmem>>, vector<16x64xf32>
    %4 = arith.addf %2, %3 : vector<16x64xf32>
    %5 = arith.truncf %4 : vector<16x64xf32> to vector<16x64xbf16>
    %c0_5 = arith.constant 0 : index
    %c0_6 = arith.constant 0 : index
    %c0_7 = arith.constant 0 : index
    %6 = vector.load %arg4[%c0_5, %c0_6, %c0_7] : memref<2x64x192xbf16, #tpu.memory_space<vmem>>, vector<1x64x192xbf16>
    %7 = vector.shape_cast %6 : vector<1x64x192xbf16> to vector<64x192xbf16>
    %cst_8 = arith.constant dense<0.000000e+00> : vector<16x192xf32>
    %8 = tpu.matmul %5, %7, %cst_8 {dimension_numbers = #tpu.dot_dimension_numbers<[1], [0], [0], [1], [0, 0, 1, 1], [], []>} : vector<16x64xbf16>, vector<64x192xbf16>, vector<16x192xf32> -> vector<16x192xf32>
    %c0_9 = arith.constant 0 : index
    %c0_10 = arith.constant 0 : index
    %c0_11 = arith.constant 0 : index
    %9 = vector.load %arg5[%c0_9, %c0_10, %c0_11] : memref<2x1x192xf32, #tpu.memory_space<vmem>>, vector<1x1x192xf32>
    %10 = vector.shape_cast %9 : vector<1x1x192xf32> to vector<1x192xf32>
    %11 = vector.broadcast %10 : vector<1x192xf32> to vector<16x192xf32>
    %12 = arith.addf %8, %11 : vector<16x192xf32>
    %13 = vector.extract_strided_slice %12 {offsets = [0, 0], sizes = [16, 16], strides = [1, 1]} : vector<16x192xf32> to vector<16x16xf32>
    %14 = vector.extract_strided_slice %12 {offsets = [0, 64], sizes = [16, 16], strides = [1, 1]} : vector<16x192xf32> to vector<16x16xf32>
    %15 = vector.extract_strided_slice %12 {offsets = [0, 128], sizes = [16, 16], strides = [1, 1]} : vector<16x192xf32> to vector<16x16xf32>
    %cst_12 = arith.constant 2.500000e-01 : f32
    %16 = vector.broadcast %cst_12 : f32 to vector<16x16xf32>
    %17 = arith.mulf %13, %16 : vector<16x16xf32>
    %18 = arith.truncf %17 : vector<16x16xf32> to vector<16x16xbf16>
    %19 = arith.truncf %14 : vector<16x16xf32> to vector<16x16xbf16>
    %cst_13 = arith.constant dense<0.000000e+00> : vector<16x16xf32>
    %20 = tpu.matmul %18, %19, %cst_13 {dimension_numbers = #tpu.dot_dimension_numbers<[1], [1], [0], [0], [0, 0, 1, 0], [], []>} : vector<16x16xbf16>, vector<16x16xbf16>, vector<16x16xf32> -> vector<16x16xf32>
    %c0_14 = arith.constant 0 : index
    %c0_15 = arith.constant 0 : index
    %21 = vector.load %arg13[%c0_14, %c0_15] : memref<16x16xf32, #tpu.memory_space<vmem>>, vector<16x16xf32>
    %22 = arith.addf %20, %21 : vector<16x16xf32>
    %cst_16 = arith.constant dense<0xFF800000> : vector<16xf32>
    %23 = vector.multi_reduction <maximumf>, %22, %cst_16 [1] : vector<16x16xf32> to vector<16xf32>
    %24 = vector.shape_cast %23 : vector<16xf32> to vector<16x1xf32>
    %25 = vector.broadcast %24 : vector<16x1xf32> to vector<16x16xf32>
    %26 = arith.subf %22, %25 : vector<16x16xf32>
    %27 = math.exp %26 : vector<16x16xf32>
    %cst_17 = arith.constant dense<0.000000e+00> : vector<16xf32>
    %28 = vector.multi_reduction <add>, %27, %cst_17 [1] : vector<16x16xf32> to vector<16xf32>
    %29 = vector.shape_cast %28 : vector<16xf32> to vector<16x1xf32>
    %30 = tpu.reciprocal %29 {approx = true} : vector<16x1xf32> -> vector<16x1xf32>
    %31 = vector.broadcast %30 : vector<16x1xf32> to vector<16x16xf32>
    %32 = arith.mulf %27, %31 : vector<16x16xf32>
    %33 = arith.truncf %32 : vector<16x16xf32> to vector<16x16xbf16>
    %34 = arith.truncf %15 : vector<16x16xf32> to vector<16x16xbf16>
    %cst_18 = arith.constant dense<0.000000e+00> : vector<16x16xf32>
    %35 = tpu.matmul %33, %34, %cst_18 {dimension_numbers = #tpu.dot_dimension_numbers<[1], [0], [0], [1], [0, 0, 1, 1], [], []>} : vector<16x16xbf16>, vector<16x16xbf16>, vector<16x16xf32> -> vector<16x16xf32>
    %36 = vector.extract_strided_slice %12 {offsets = [0, 16], sizes = [16, 16], strides = [1, 1]} : vector<16x192xf32> to vector<16x16xf32>
    %37 = vector.extract_strided_slice %12 {offsets = [0, 80], sizes = [16, 16], strides = [1, 1]} : vector<16x192xf32> to vector<16x16xf32>
    %38 = vector.extract_strided_slice %12 {offsets = [0, 144], sizes = [16, 16], strides = [1, 1]} : vector<16x192xf32> to vector<16x16xf32>
    %cst_19 = arith.constant 2.500000e-01 : f32
    %39 = vector.broadcast %cst_19 : f32 to vector<16x16xf32>
    %40 = arith.mulf %36, %39 : vector<16x16xf32>
    %41 = arith.truncf %40 : vector<16x16xf32> to vector<16x16xbf16>
    %42 = arith.truncf %37 : vector<16x16xf32> to vector<16x16xbf16>
    %cst_20 = arith.constant dense<0.000000e+00> : vector<16x16xf32>
    %43 = tpu.matmul %41, %42, %cst_20 {dimension_numbers = #tpu.dot_dimension_numbers<[1], [1], [0], [0], [0, 0, 1, 0], [], []>} : vector<16x16xbf16>, vector<16x16xbf16>, vector<16x16xf32> -> vector<16x16xf32>
    %c0_21 = arith.constant 0 : index
    %c0_22 = arith.constant 0 : index
    %44 = vector.load %arg13[%c0_21, %c0_22] : memref<16x16xf32, #tpu.memory_space<vmem>>, vector<16x16xf32>
    %45 = arith.addf %43, %44 : vector<16x16xf32>
    %cst_23 = arith.constant dense<0xFF800000> : vector<16xf32>
    %46 = vector.multi_reduction <maximumf>, %45, %cst_23 [1] : vector<16x16xf32> to vector<16xf32>
    %47 = vector.shape_cast %46 : vector<16xf32> to vector<16x1xf32>
    %48 = vector.broadcast %47 : vector<16x1xf32> to vector<16x16xf32>
    %49 = arith.subf %45, %48 : vector<16x16xf32>
    %50 = math.exp %49 : vector<16x16xf32>
    %cst_24 = arith.constant dense<0.000000e+00> : vector<16xf32>
    %51 = vector.multi_reduction <add>, %50, %cst_24 [1] : vector<16x16xf32> to vector<16xf32>
    %52 = vector.shape_cast %51 : vector<16xf32> to vector<16x1xf32>
    %53 = tpu.reciprocal %52 {approx = true} : vector<16x1xf32> -> vector<16x1xf32>
    %54 = vector.broadcast %53 : vector<16x1xf32> to vector<16x16xf32>
    %55 = arith.mulf %50, %54 : vector<16x16xf32>
    %56 = arith.truncf %55 : vector<16x16xf32> to vector<16x16xbf16>
    %57 = arith.truncf %38 : vector<16x16xf32> to vector<16x16xbf16>
    %cst_25 = arith.constant dense<0.000000e+00> : vector<16x16xf32>
    %58 = tpu.matmul %56, %57, %cst_25 {dimension_numbers = #tpu.dot_dimension_numbers<[1], [0], [0], [1], [0, 0, 1, 1], [], []>} : vector<16x16xbf16>, vector<16x16xbf16>, vector<16x16xf32> -> vector<16x16xf32>
    %59 = vector.extract_strided_slice %12 {offsets = [0, 32], sizes = [16, 16], strides = [1, 1]} : vector<16x192xf32> to vector<16x16xf32>
    %60 = vector.extract_strided_slice %12 {offsets = [0, 96], sizes = [16, 16], strides = [1, 1]} : vector<16x192xf32> to vector<16x16xf32>
    %61 = vector.extract_strided_slice %12 {offsets = [0, 160], sizes = [16, 16], strides = [1, 1]} : vector<16x192xf32> to vector<16x16xf32>
    %cst_26 = arith.constant 2.500000e-01 : f32
    %62 = vector.broadcast %cst_26 : f32 to vector<16x16xf32>
    %63 = arith.mulf %59, %62 : vector<16x16xf32>
    %64 = arith.truncf %63 : vector<16x16xf32> to vector<16x16xbf16>
    %65 = arith.truncf %60 : vector<16x16xf32> to vector<16x16xbf16>
    %cst_27 = arith.constant dense<0.000000e+00> : vector<16x16xf32>
    %66 = tpu.matmul %64, %65, %cst_27 {dimension_numbers = #tpu.dot_dimension_numbers<[1], [1], [0], [0], [0, 0, 1, 0], [], []>} : vector<16x16xbf16>, vector<16x16xbf16>, vector<16x16xf32> -> vector<16x16xf32>
    %c0_28 = arith.constant 0 : index
    %c0_29 = arith.constant 0 : index
    %67 = vector.load %arg13[%c0_28, %c0_29] : memref<16x16xf32, #tpu.memory_space<vmem>>, vector<16x16xf32>
    %68 = arith.addf %66, %67 : vector<16x16xf32>
    %cst_30 = arith.constant dense<0xFF800000> : vector<16xf32>
    %69 = vector.multi_reduction <maximumf>, %68, %cst_30 [1] : vector<16x16xf32> to vector<16xf32>
    %70 = vector.shape_cast %69 : vector<16xf32> to vector<16x1xf32>
    %71 = vector.broadcast %70 : vector<16x1xf32> to vector<16x16xf32>
    %72 = arith.subf %68, %71 : vector<16x16xf32>
    %73 = math.exp %72 : vector<16x16xf32>
    %cst_31 = arith.constant dense<0.000000e+00> : vector<16xf32>
    %74 = vector.multi_reduction <add>, %73, %cst_31 [1] : vector<16x16xf32> to vector<16xf32>
    %75 = vector.shape_cast %74 : vector<16xf32> to vector<16x1xf32>
    %76 = tpu.reciprocal %75 {approx = true} : vector<16x1xf32> -> vector<16x1xf32>
    %77 = vector.broadcast %76 : vector<16x1xf32> to vector<16x16xf32>
    %78 = arith.mulf %73, %77 : vector<16x16xf32>
    %79 = arith.truncf %78 : vector<16x16xf32> to vector<16x16xbf16>
    %80 = arith.truncf %61 : vector<16x16xf32> to vector<16x16xbf16>
    %cst_32 = arith.constant dense<0.000000e+00> : vector<16x16xf32>
    %81 = tpu.matmul %79, %80, %cst_32 {dimension_numbers = #tpu.dot_dimension_numbers<[1], [0], [0], [1], [0, 0, 1, 1], [], []>} : vector<16x16xbf16>, vector<16x16xbf16>, vector<16x16xf32> -> vector<16x16xf32>
    %82 = vector.extract_strided_slice %12 {offsets = [0, 48], sizes = [16, 16], strides = [1, 1]} : vector<16x192xf32> to vector<16x16xf32>
    %83 = vector.extract_strided_slice %12 {offsets = [0, 112], sizes = [16, 16], strides = [1, 1]} : vector<16x192xf32> to vector<16x16xf32>
    %84 = vector.extract_strided_slice %12 {offsets = [0, 176], sizes = [16, 16], strides = [1, 1]} : vector<16x192xf32> to vector<16x16xf32>
    %cst_33 = arith.constant 2.500000e-01 : f32
    %85 = vector.broadcast %cst_33 : f32 to vector<16x16xf32>
    %86 = arith.mulf %82, %85 : vector<16x16xf32>
    %87 = arith.truncf %86 : vector<16x16xf32> to vector<16x16xbf16>
    %88 = arith.truncf %83 : vector<16x16xf32> to vector<16x16xbf16>
    %cst_34 = arith.constant dense<0.000000e+00> : vector<16x16xf32>
    %89 = tpu.matmul %87, %88, %cst_34 {dimension_numbers = #tpu.dot_dimension_numbers<[1], [1], [0], [0], [0, 0, 1, 0], [], []>} : vector<16x16xbf16>, vector<16x16xbf16>, vector<16x16xf32> -> vector<16x16xf32>
    %c0_35 = arith.constant 0 : index
    %c0_36 = arith.constant 0 : index
    %90 = vector.load %arg13[%c0_35, %c0_36] : memref<16x16xf32, #tpu.memory_space<vmem>>, vector<16x16xf32>
    %91 = arith.addf %89, %90 : vector<16x16xf32>
    %cst_37 = arith.constant dense<0xFF800000> : vector<16xf32>
    %92 = vector.multi_reduction <maximumf>, %91, %cst_37 [1] : vector<16x16xf32> to vector<16xf32>
    %93 = vector.shape_cast %92 : vector<16xf32> to vector<16x1xf32>
    %94 = vector.broadcast %93 : vector<16x1xf32> to vector<16x16xf32>
    %95 = arith.subf %91, %94 : vector<16x16xf32>
    %96 = math.exp %95 : vector<16x16xf32>
    %cst_38 = arith.constant dense<0.000000e+00> : vector<16xf32>
    %97 = vector.multi_reduction <add>, %96, %cst_38 [1] : vector<16x16xf32> to vector<16xf32>
    %98 = vector.shape_cast %97 : vector<16xf32> to vector<16x1xf32>
    %99 = tpu.reciprocal %98 {approx = true} : vector<16x1xf32> -> vector<16x1xf32>
    %100 = vector.broadcast %99 : vector<16x1xf32> to vector<16x16xf32>
    %101 = arith.mulf %96, %100 : vector<16x16xf32>
    %102 = arith.truncf %101 : vector<16x16xf32> to vector<16x16xbf16>
    %103 = arith.truncf %84 : vector<16x16xf32> to vector<16x16xbf16>
    %cst_39 = arith.constant dense<0.000000e+00> : vector<16x16xf32>
    %104 = tpu.matmul %102, %103, %cst_39 {dimension_numbers = #tpu.dot_dimension_numbers<[1], [0], [0], [1], [0, 0, 1, 1], [], []>} : vector<16x16xbf16>, vector<16x16xbf16>, vector<16x16xf32> -> vector<16x16xf32>
    %105 = tpu.concatenate %35, %58, %81, %104 in 1 : vector<16x16xf32>, vector<16x16xf32>, vector<16x16xf32>, vector<16x16xf32> -> vector<16x64xf32>
    %106 = arith.truncf %105 : vector<16x64xf32> to vector<16x64xbf16>
    %c0_40 = arith.constant 0 : index
    %c0_41 = arith.constant 0 : index
    %c0_42 = arith.constant 0 : index
    %107 = vector.load %arg6[%c0_40, %c0_41, %c0_42] : memref<2x64x64xbf16, #tpu.memory_space<vmem>>, vector<1x64x64xbf16>
    %108 = vector.shape_cast %107 : vector<1x64x64xbf16> to vector<64x64xbf16>
    %cst_43 = arith.constant dense<0.000000e+00> : vector<16x64xf32>
    %109 = tpu.matmul %106, %108, %cst_43 {dimension_numbers = #tpu.dot_dimension_numbers<[1], [0], [0], [1], [0, 0, 1, 1], [], []>} : vector<16x64xbf16>, vector<64x64xbf16>, vector<16x64xf32> -> vector<16x64xf32>
    %c0_44 = arith.constant 0 : index
    %c0_45 = arith.constant 0 : index
    %c0_46 = arith.constant 0 : index
    %110 = vector.load %arg7[%c0_44, %c0_45, %c0_46] : memref<2x1x64xf32, #tpu.memory_space<vmem>>, vector<1x1x64xf32>
    %111 = vector.shape_cast %110 : vector<1x1x64xf32> to vector<1x64xf32>
    %112 = vector.broadcast %111 : vector<1x64xf32> to vector<16x64xf32>
    %113 = arith.addf %109, %112 : vector<16x64xf32>
    %114 = arith.addf %4, %113 : vector<16x64xf32>
    %c0_47 = arith.constant 0 : index
    %c0_48 = arith.constant 0 : index
    %c0_49 = arith.constant 0 : index
    %115 = vector.load %arg10[%c0_47, %c0_48, %c0_49] : memref<8x1x64xf32, #tpu.memory_space<vmem>>, vector<1x1x64xf32>
    %116 = vector.shape_cast %115 : vector<1x1x64xf32> to vector<1x64xf32>
    %c1 = arith.constant 1 : index
    %c0_50 = arith.constant 0 : index
    %c0_51 = arith.constant 0 : index
    %117 = vector.load %arg10[%c1, %c0_50, %c0_51] : memref<8x1x64xf32, #tpu.memory_space<vmem>>, vector<1x1x64xf32>
    %118 = vector.shape_cast %117 : vector<1x1x64xf32> to vector<1x64xf32>
    %cst_52 = arith.constant dense<0.000000e+00> : vector<16xf32>
    %119 = vector.multi_reduction <add>, %114, %cst_52 [1] : vector<16x64xf32> to vector<16xf32>
    %120 = vector.shape_cast %119 : vector<16xf32> to vector<16x1xf32>
    %cst_53 = arith.constant 1.562500e-02 : f32
    %121 = vector.broadcast %cst_53 : f32 to vector<16x1xf32>
    %122 = arith.mulf %120, %121 : vector<16x1xf32>
    %123 = arith.mulf %114, %114 : vector<16x64xf32>
    %cst_54 = arith.constant dense<0.000000e+00> : vector<16xf32>
    %124 = vector.multi_reduction <add>, %123, %cst_54 [1] : vector<16x64xf32> to vector<16xf32>
    %125 = vector.shape_cast %124 : vector<16xf32> to vector<16x1xf32>
    %cst_55 = arith.constant 1.562500e-02 : f32
    %126 = vector.broadcast %cst_55 : f32 to vector<16x1xf32>
    %127 = arith.mulf %125, %126 : vector<16x1xf32>
    %128 = arith.mulf %122, %122 : vector<16x1xf32>
    %129 = arith.subf %127, %128 : vector<16x1xf32>
    %cst_56 = arith.constant 0.000000e+00 : f32
    %130 = vector.broadcast %cst_56 : f32 to vector<16x1xf32>
    %131 = arith.maximumf %129, %130 : vector<16x1xf32>
    %132 = vector.broadcast %122 : vector<16x1xf32> to vector<16x64xf32>
    %133 = arith.subf %114, %132 : vector<16x64xf32>
    %cst_57 = arith.constant 9.99999974E-6 : f32
    %134 = vector.broadcast %cst_57 : f32 to vector<16x1xf32>
    %135 = arith.addf %131, %134 : vector<16x1xf32>
    %136 = math.rsqrt %135 : vector<16x1xf32>
    %137 = vector.broadcast %136 : vector<16x1xf32> to vector<16x64xf32>
    %138 = arith.mulf %133, %137 : vector<16x64xf32>
    %139 = vector.broadcast %116 : vector<1x64xf32> to vector<16x64xf32>
    %140 = arith.mulf %138, %139 : vector<16x64xf32>
    %141 = vector.broadcast %118 : vector<1x64xf32> to vector<16x64xf32>
    %142 = arith.addf %140, %141 : vector<16x64xf32>
    %143 = arith.truncf %142 : vector<16x64xf32> to vector<16x64xbf16>
    %c0_58 = arith.constant 0 : index
    %c0_59 = arith.constant 0 : index
    %c0_60 = arith.constant 0 : index
    %144 = vector.load %arg8[%c0_58, %c0_59, %c0_60] : memref<4x64x64xbf16, #tpu.memory_space<vmem>>, vector<1x64x64xbf16>
    %145 = vector.shape_cast %144 : vector<1x64x64xbf16> to vector<64x64xbf16>
    %cst_61 = arith.constant dense<0.000000e+00> : vector<16x64xf32>
    %146 = tpu.matmul %143, %145, %cst_61 {dimension_numbers = #tpu.dot_dimension_numbers<[1], [0], [0], [1], [0, 0, 1, 1], [], []>} : vector<16x64xbf16>, vector<64x64xbf16>, vector<16x64xf32> -> vector<16x64xf32>
    %c0_62 = arith.constant 0 : index
    %c0_63 = arith.constant 0 : index
    %c0_64 = arith.constant 0 : index
    %147 = vector.load %arg9[%c0_62, %c0_63, %c0_64] : memref<4x1x64xf32, #tpu.memory_space<vmem>>, vector<1x1x64xf32>
    %148 = vector.shape_cast %147 : vector<1x1x64xf32> to vector<1x64xf32>
    %149 = vector.broadcast %148 : vector<1x64xf32> to vector<16x64xf32>
    %150 = arith.addf %146, %149 : vector<16x64xf32>
    %cst_65 = arith.constant 0.000000e+00 : f32
    %151 = vector.broadcast %cst_65 : f32 to vector<16x64xf32>
    %152 = arith.maximumf %150, %151 : vector<16x64xf32>
    %153 = arith.truncf %152 : vector<16x64xf32> to vector<16x64xbf16>
    %c1_66 = arith.constant 1 : index
    %c0_67 = arith.constant 0 : index
    %c0_68 = arith.constant 0 : index
    %154 = vector.load %arg8[%c1_66, %c0_67, %c0_68] : memref<4x64x64xbf16, #tpu.memory_space<vmem>>, vector<1x64x64xbf16>
    %155 = vector.shape_cast %154 : vector<1x64x64xbf16> to vector<64x64xbf16>
    %cst_69 = arith.constant dense<0.000000e+00> : vector<16x64xf32>
    %156 = tpu.matmul %153, %155, %cst_69 {dimension_numbers = #tpu.dot_dimension_numbers<[1], [0], [0], [1], [0, 0, 1, 1], [], []>} : vector<16x64xbf16>, vector<64x64xbf16>, vector<16x64xf32> -> vector<16x64xf32>
    %c1_70 = arith.constant 1 : index
    %c0_71 = arith.constant 0 : index
    %c0_72 = arith.constant 0 : index
    %157 = vector.load %arg9[%c1_70, %c0_71, %c0_72] : memref<4x1x64xf32, #tpu.memory_space<vmem>>, vector<1x1x64xf32>
    %158 = vector.shape_cast %157 : vector<1x1x64xf32> to vector<1x64xf32>
    %159 = vector.broadcast %158 : vector<1x64xf32> to vector<16x64xf32>
    %160 = arith.addf %156, %159 : vector<16x64xf32>
    %161 = arith.addf %142, %160 : vector<16x64xf32>
    %c2 = arith.constant 2 : index
    %c0_73 = arith.constant 0 : index
    %c0_74 = arith.constant 0 : index
    %162 = vector.load %arg10[%c2, %c0_73, %c0_74] : memref<8x1x64xf32, #tpu.memory_space<vmem>>, vector<1x1x64xf32>
    %163 = vector.shape_cast %162 : vector<1x1x64xf32> to vector<1x64xf32>
    %c3 = arith.constant 3 : index
    %c0_75 = arith.constant 0 : index
    %c0_76 = arith.constant 0 : index
    %164 = vector.load %arg10[%c3, %c0_75, %c0_76] : memref<8x1x64xf32, #tpu.memory_space<vmem>>, vector<1x1x64xf32>
    %165 = vector.shape_cast %164 : vector<1x1x64xf32> to vector<1x64xf32>
    %cst_77 = arith.constant dense<0.000000e+00> : vector<16xf32>
    %166 = vector.multi_reduction <add>, %161, %cst_77 [1] : vector<16x64xf32> to vector<16xf32>
    %167 = vector.shape_cast %166 : vector<16xf32> to vector<16x1xf32>
    %cst_78 = arith.constant 1.562500e-02 : f32
    %168 = vector.broadcast %cst_78 : f32 to vector<16x1xf32>
    %169 = arith.mulf %167, %168 : vector<16x1xf32>
    %170 = arith.mulf %161, %161 : vector<16x64xf32>
    %cst_79 = arith.constant dense<0.000000e+00> : vector<16xf32>
    %171 = vector.multi_reduction <add>, %170, %cst_79 [1] : vector<16x64xf32> to vector<16xf32>
    %172 = vector.shape_cast %171 : vector<16xf32> to vector<16x1xf32>
    %cst_80 = arith.constant 1.562500e-02 : f32
    %173 = vector.broadcast %cst_80 : f32 to vector<16x1xf32>
    %174 = arith.mulf %172, %173 : vector<16x1xf32>
    %175 = arith.mulf %169, %169 : vector<16x1xf32>
    %176 = arith.subf %174, %175 : vector<16x1xf32>
    %cst_81 = arith.constant 0.000000e+00 : f32
    %177 = vector.broadcast %cst_81 : f32 to vector<16x1xf32>
    %178 = arith.maximumf %176, %177 : vector<16x1xf32>
    %179 = vector.broadcast %169 : vector<16x1xf32> to vector<16x64xf32>
    %180 = arith.subf %161, %179 : vector<16x64xf32>
    %cst_82 = arith.constant 9.99999974E-6 : f32
    %181 = vector.broadcast %cst_82 : f32 to vector<16x1xf32>
    %182 = arith.addf %178, %181 : vector<16x1xf32>
    %183 = math.rsqrt %182 : vector<16x1xf32>
    %184 = vector.broadcast %183 : vector<16x1xf32> to vector<16x64xf32>
    %185 = arith.mulf %180, %184 : vector<16x64xf32>
    %186 = vector.broadcast %163 : vector<1x64xf32> to vector<16x64xf32>
    %187 = arith.mulf %185, %186 : vector<16x64xf32>
    %188 = vector.broadcast %165 : vector<1x64xf32> to vector<16x64xf32>
    %189 = arith.addf %187, %188 : vector<16x64xf32>
    %190 = arith.truncf %189 : vector<16x64xf32> to vector<16x64xbf16>
    %c1_83 = arith.constant 1 : index
    %c0_84 = arith.constant 0 : index
    %c0_85 = arith.constant 0 : index
    %191 = vector.load %arg4[%c1_83, %c0_84, %c0_85] : memref<2x64x192xbf16, #tpu.memory_space<vmem>>, vector<1x64x192xbf16>
    %192 = vector.shape_cast %191 : vector<1x64x192xbf16> to vector<64x192xbf16>
    %cst_86 = arith.constant dense<0.000000e+00> : vector<16x192xf32>
    %193 = tpu.matmul %190, %192, %cst_86 {dimension_numbers = #tpu.dot_dimension_numbers<[1], [0], [0], [1], [0, 0, 1, 1], [], []>} : vector<16x64xbf16>, vector<64x192xbf16>, vector<16x192xf32> -> vector<16x192xf32>
    %c1_87 = arith.constant 1 : index
    %c0_88 = arith.constant 0 : index
    %c0_89 = arith.constant 0 : index
    %194 = vector.load %arg5[%c1_87, %c0_88, %c0_89] : memref<2x1x192xf32, #tpu.memory_space<vmem>>, vector<1x1x192xf32>
    %195 = vector.shape_cast %194 : vector<1x1x192xf32> to vector<1x192xf32>
    %196 = vector.broadcast %195 : vector<1x192xf32> to vector<16x192xf32>
    %197 = arith.addf %193, %196 : vector<16x192xf32>
    %198 = vector.extract_strided_slice %197 {offsets = [0, 0], sizes = [16, 16], strides = [1, 1]} : vector<16x192xf32> to vector<16x16xf32>
    %199 = vector.extract_strided_slice %197 {offsets = [0, 64], sizes = [16, 16], strides = [1, 1]} : vector<16x192xf32> to vector<16x16xf32>
    %200 = vector.extract_strided_slice %197 {offsets = [0, 128], sizes = [16, 16], strides = [1, 1]} : vector<16x192xf32> to vector<16x16xf32>
    %cst_90 = arith.constant 2.500000e-01 : f32
    %201 = vector.broadcast %cst_90 : f32 to vector<16x16xf32>
    %202 = arith.mulf %198, %201 : vector<16x16xf32>
    %203 = arith.truncf %202 : vector<16x16xf32> to vector<16x16xbf16>
    %204 = arith.truncf %199 : vector<16x16xf32> to vector<16x16xbf16>
    %cst_91 = arith.constant dense<0.000000e+00> : vector<16x16xf32>
    %205 = tpu.matmul %203, %204, %cst_91 {dimension_numbers = #tpu.dot_dimension_numbers<[1], [1], [0], [0], [0, 0, 1, 0], [], []>} : vector<16x16xbf16>, vector<16x16xbf16>, vector<16x16xf32> -> vector<16x16xf32>
    %c0_92 = arith.constant 0 : index
    %c0_93 = arith.constant 0 : index
    %206 = vector.load %arg13[%c0_92, %c0_93] : memref<16x16xf32, #tpu.memory_space<vmem>>, vector<16x16xf32>
    %207 = arith.addf %205, %206 : vector<16x16xf32>
    %cst_94 = arith.constant dense<0xFF800000> : vector<16xf32>
    %208 = vector.multi_reduction <maximumf>, %207, %cst_94 [1] : vector<16x16xf32> to vector<16xf32>
    %209 = vector.shape_cast %208 : vector<16xf32> to vector<16x1xf32>
    %210 = vector.broadcast %209 : vector<16x1xf32> to vector<16x16xf32>
    %211 = arith.subf %207, %210 : vector<16x16xf32>
    %212 = math.exp %211 : vector<16x16xf32>
    %cst_95 = arith.constant dense<0.000000e+00> : vector<16xf32>
    %213 = vector.multi_reduction <add>, %212, %cst_95 [1] : vector<16x16xf32> to vector<16xf32>
    %214 = vector.shape_cast %213 : vector<16xf32> to vector<16x1xf32>
    %215 = tpu.reciprocal %214 {approx = true} : vector<16x1xf32> -> vector<16x1xf32>
    %216 = vector.broadcast %215 : vector<16x1xf32> to vector<16x16xf32>
    %217 = arith.mulf %212, %216 : vector<16x16xf32>
    %218 = arith.truncf %217 : vector<16x16xf32> to vector<16x16xbf16>
    %219 = arith.truncf %200 : vector<16x16xf32> to vector<16x16xbf16>
    %cst_96 = arith.constant dense<0.000000e+00> : vector<16x16xf32>
    %220 = tpu.matmul %218, %219, %cst_96 {dimension_numbers = #tpu.dot_dimension_numbers<[1], [0], [0], [1], [0, 0, 1, 1], [], []>} : vector<16x16xbf16>, vector<16x16xbf16>, vector<16x16xf32> -> vector<16x16xf32>
    %221 = vector.extract_strided_slice %197 {offsets = [0, 16], sizes = [16, 16], strides = [1, 1]} : vector<16x192xf32> to vector<16x16xf32>
    %222 = vector.extract_strided_slice %197 {offsets = [0, 80], sizes = [16, 16], strides = [1, 1]} : vector<16x192xf32> to vector<16x16xf32>
    %223 = vector.extract_strided_slice %197 {offsets = [0, 144], sizes = [16, 16], strides = [1, 1]} : vector<16x192xf32> to vector<16x16xf32>
    %cst_97 = arith.constant 2.500000e-01 : f32
    %224 = vector.broadcast %cst_97 : f32 to vector<16x16xf32>
    %225 = arith.mulf %221, %224 : vector<16x16xf32>
    %226 = arith.truncf %225 : vector<16x16xf32> to vector<16x16xbf16>
    %227 = arith.truncf %222 : vector<16x16xf32> to vector<16x16xbf16>
    %cst_98 = arith.constant dense<0.000000e+00> : vector<16x16xf32>
    %228 = tpu.matmul %226, %227, %cst_98 {dimension_numbers = #tpu.dot_dimension_numbers<[1], [1], [0], [0], [0, 0, 1, 0], [], []>} : vector<16x16xbf16>, vector<16x16xbf16>, vector<16x16xf32> -> vector<16x16xf32>
    %c0_99 = arith.constant 0 : index
    %c0_100 = arith.constant 0 : index
    %229 = vector.load %arg13[%c0_99, %c0_100] : memref<16x16xf32, #tpu.memory_space<vmem>>, vector<16x16xf32>
    %230 = arith.addf %228, %229 : vector<16x16xf32>
    %cst_101 = arith.constant dense<0xFF800000> : vector<16xf32>
    %231 = vector.multi_reduction <maximumf>, %230, %cst_101 [1] : vector<16x16xf32> to vector<16xf32>
    %232 = vector.shape_cast %231 : vector<16xf32> to vector<16x1xf32>
    %233 = vector.broadcast %232 : vector<16x1xf32> to vector<16x16xf32>
    %234 = arith.subf %230, %233 : vector<16x16xf32>
    %235 = math.exp %234 : vector<16x16xf32>
    %cst_102 = arith.constant dense<0.000000e+00> : vector<16xf32>
    %236 = vector.multi_reduction <add>, %235, %cst_102 [1] : vector<16x16xf32> to vector<16xf32>
    %237 = vector.shape_cast %236 : vector<16xf32> to vector<16x1xf32>
    %238 = tpu.reciprocal %237 {approx = true} : vector<16x1xf32> -> vector<16x1xf32>
    %239 = vector.broadcast %238 : vector<16x1xf32> to vector<16x16xf32>
    %240 = arith.mulf %235, %239 : vector<16x16xf32>
    %241 = arith.truncf %240 : vector<16x16xf32> to vector<16x16xbf16>
    %242 = arith.truncf %223 : vector<16x16xf32> to vector<16x16xbf16>
    %cst_103 = arith.constant dense<0.000000e+00> : vector<16x16xf32>
    %243 = tpu.matmul %241, %242, %cst_103 {dimension_numbers = #tpu.dot_dimension_numbers<[1], [0], [0], [1], [0, 0, 1, 1], [], []>} : vector<16x16xbf16>, vector<16x16xbf16>, vector<16x16xf32> -> vector<16x16xf32>
    %244 = vector.extract_strided_slice %197 {offsets = [0, 32], sizes = [16, 16], strides = [1, 1]} : vector<16x192xf32> to vector<16x16xf32>
    %245 = vector.extract_strided_slice %197 {offsets = [0, 96], sizes = [16, 16], strides = [1, 1]} : vector<16x192xf32> to vector<16x16xf32>
    %246 = vector.extract_strided_slice %197 {offsets = [0, 160], sizes = [16, 16], strides = [1, 1]} : vector<16x192xf32> to vector<16x16xf32>
    %cst_104 = arith.constant 2.500000e-01 : f32
    %247 = vector.broadcast %cst_104 : f32 to vector<16x16xf32>
    %248 = arith.mulf %244, %247 : vector<16x16xf32>
    %249 = arith.truncf %248 : vector<16x16xf32> to vector<16x16xbf16>
    %250 = arith.truncf %245 : vector<16x16xf32> to vector<16x16xbf16>
    %cst_105 = arith.constant dense<0.000000e+00> : vector<16x16xf32>
    %251 = tpu.matmul %249, %250, %cst_105 {dimension_numbers = #tpu.dot_dimension_numbers<[1], [1], [0], [0], [0, 0, 1, 0], [], []>} : vector<16x16xbf16>, vector<16x16xbf16>, vector<16x16xf32> -> vector<16x16xf32>
    %c0_106 = arith.constant 0 : index
    %c0_107 = arith.constant 0 : index
    %252 = vector.load %arg13[%c0_106, %c0_107] : memref<16x16xf32, #tpu.memory_space<vmem>>, vector<16x16xf32>
    %253 = arith.addf %251, %252 : vector<16x16xf32>
    %cst_108 = arith.constant dense<0xFF800000> : vector<16xf32>
    %254 = vector.multi_reduction <maximumf>, %253, %cst_108 [1] : vector<16x16xf32> to vector<16xf32>
    %255 = vector.shape_cast %254 : vector<16xf32> to vector<16x1xf32>
    %256 = vector.broadcast %255 : vector<16x1xf32> to vector<16x16xf32>
    %257 = arith.subf %253, %256 : vector<16x16xf32>
    %258 = math.exp %257 : vector<16x16xf32>
    %cst_109 = arith.constant dense<0.000000e+00> : vector<16xf32>
    %259 = vector.multi_reduction <add>, %258, %cst_109 [1] : vector<16x16xf32> to vector<16xf32>
    %260 = vector.shape_cast %259 : vector<16xf32> to vector<16x1xf32>
    %261 = tpu.reciprocal %260 {approx = true} : vector<16x1xf32> -> vector<16x1xf32>
    %262 = vector.broadcast %261 : vector<16x1xf32> to vector<16x16xf32>
    %263 = arith.mulf %258, %262 : vector<16x16xf32>
    %264 = arith.truncf %263 : vector<16x16xf32> to vector<16x16xbf16>
    %265 = arith.truncf %246 : vector<16x16xf32> to vector<16x16xbf16>
    %cst_110 = arith.constant dense<0.000000e+00> : vector<16x16xf32>
    %266 = tpu.matmul %264, %265, %cst_110 {dimension_numbers = #tpu.dot_dimension_numbers<[1], [0], [0], [1], [0, 0, 1, 1], [], []>} : vector<16x16xbf16>, vector<16x16xbf16>, vector<16x16xf32> -> vector<16x16xf32>
    %267 = vector.extract_strided_slice %197 {offsets = [0, 48], sizes = [16, 16], strides = [1, 1]} : vector<16x192xf32> to vector<16x16xf32>
    %268 = vector.extract_strided_slice %197 {offsets = [0, 112], sizes = [16, 16], strides = [1, 1]} : vector<16x192xf32> to vector<16x16xf32>
    %269 = vector.extract_strided_slice %197 {offsets = [0, 176], sizes = [16, 16], strides = [1, 1]} : vector<16x192xf32> to vector<16x16xf32>
    %cst_111 = arith.constant 2.500000e-01 : f32
    %270 = vector.broadcast %cst_111 : f32 to vector<16x16xf32>
    %271 = arith.mulf %267, %270 : vector<16x16xf32>
    %272 = arith.truncf %271 : vector<16x16xf32> to vector<16x16xbf16>
    %273 = arith.truncf %268 : vector<16x16xf32> to vector<16x16xbf16>
    %cst_112 = arith.constant dense<0.000000e+00> : vector<16x16xf32>
    %274 = tpu.matmul %272, %273, %cst_112 {dimension_numbers = #tpu.dot_dimension_numbers<[1], [1], [0], [0], [0, 0, 1, 0], [], []>} : vector<16x16xbf16>, vector<16x16xbf16>, vector<16x16xf32> -> vector<16x16xf32>
    %c0_113 = arith.constant 0 : index
    %c0_114 = arith.constant 0 : index
    %275 = vector.load %arg13[%c0_113, %c0_114] : memref<16x16xf32, #tpu.memory_space<vmem>>, vector<16x16xf32>
    %276 = arith.addf %274, %275 : vector<16x16xf32>
    %cst_115 = arith.constant dense<0xFF800000> : vector<16xf32>
    %277 = vector.multi_reduction <maximumf>, %276, %cst_115 [1] : vector<16x16xf32> to vector<16xf32>
    %278 = vector.shape_cast %277 : vector<16xf32> to vector<16x1xf32>
    %279 = vector.broadcast %278 : vector<16x1xf32> to vector<16x16xf32>
    %280 = arith.subf %276, %279 : vector<16x16xf32>
    %281 = math.exp %280 : vector<16x16xf32>
    %cst_116 = arith.constant dense<0.000000e+00> : vector<16xf32>
    %282 = vector.multi_reduction <add>, %281, %cst_116 [1] : vector<16x16xf32> to vector<16xf32>
    %283 = vector.shape_cast %282 : vector<16xf32> to vector<16x1xf32>
    %284 = tpu.reciprocal %283 {approx = true} : vector<16x1xf32> -> vector<16x1xf32>
    %285 = vector.broadcast %284 : vector<16x1xf32> to vector<16x16xf32>
    %286 = arith.mulf %281, %285 : vector<16x16xf32>
    %287 = arith.truncf %286 : vector<16x16xf32> to vector<16x16xbf16>
    %288 = arith.truncf %269 : vector<16x16xf32> to vector<16x16xbf16>
    %cst_117 = arith.constant dense<0.000000e+00> : vector<16x16xf32>
    %289 = tpu.matmul %287, %288, %cst_117 {dimension_numbers = #tpu.dot_dimension_numbers<[1], [0], [0], [1], [0, 0, 1, 1], [], []>} : vector<16x16xbf16>, vector<16x16xbf16>, vector<16x16xf32> -> vector<16x16xf32>
    %290 = tpu.concatenate %220, %243, %266, %289 in 1 : vector<16x16xf32>, vector<16x16xf32>, vector<16x16xf32>, vector<16x16xf32> -> vector<16x64xf32>
    %291 = arith.truncf %290 : vector<16x64xf32> to vector<16x64xbf16>
    %c1_118 = arith.constant 1 : index
    %c0_119 = arith.constant 0 : index
    %c0_120 = arith.constant 0 : index
    %292 = vector.load %arg6[%c1_118, %c0_119, %c0_120] : memref<2x64x64xbf16, #tpu.memory_space<vmem>>, vector<1x64x64xbf16>
    %293 = vector.shape_cast %292 : vector<1x64x64xbf16> to vector<64x64xbf16>
    %cst_121 = arith.constant dense<0.000000e+00> : vector<16x64xf32>
    %294 = tpu.matmul %291, %293, %cst_121 {dimension_numbers = #tpu.dot_dimension_numbers<[1], [0], [0], [1], [0, 0, 1, 1], [], []>} : vector<16x64xbf16>, vector<64x64xbf16>, vector<16x64xf32> -> vector<16x64xf32>
    %c1_122 = arith.constant 1 : index
    %c0_123 = arith.constant 0 : index
    %c0_124 = arith.constant 0 : index
    %295 = vector.load %arg7[%c1_122, %c0_123, %c0_124] : memref<2x1x64xf32, #tpu.memory_space<vmem>>, vector<1x1x64xf32>
    %296 = vector.shape_cast %295 : vector<1x1x64xf32> to vector<1x64xf32>
    %297 = vector.broadcast %296 : vector<1x64xf32> to vector<16x64xf32>
    %298 = arith.addf %294, %297 : vector<16x64xf32>
    %299 = arith.addf %189, %298 : vector<16x64xf32>
    %c4 = arith.constant 4 : index
    %c0_125 = arith.constant 0 : index
    %c0_126 = arith.constant 0 : index
    %300 = vector.load %arg10[%c4, %c0_125, %c0_126] : memref<8x1x64xf32, #tpu.memory_space<vmem>>, vector<1x1x64xf32>
    %301 = vector.shape_cast %300 : vector<1x1x64xf32> to vector<1x64xf32>
    %c5 = arith.constant 5 : index
    %c0_127 = arith.constant 0 : index
    %c0_128 = arith.constant 0 : index
    %302 = vector.load %arg10[%c5, %c0_127, %c0_128] : memref<8x1x64xf32, #tpu.memory_space<vmem>>, vector<1x1x64xf32>
    %303 = vector.shape_cast %302 : vector<1x1x64xf32> to vector<1x64xf32>
    %cst_129 = arith.constant dense<0.000000e+00> : vector<16xf32>
    %304 = vector.multi_reduction <add>, %299, %cst_129 [1] : vector<16x64xf32> to vector<16xf32>
    %305 = vector.shape_cast %304 : vector<16xf32> to vector<16x1xf32>
    %cst_130 = arith.constant 1.562500e-02 : f32
    %306 = vector.broadcast %cst_130 : f32 to vector<16x1xf32>
    %307 = arith.mulf %305, %306 : vector<16x1xf32>
    %308 = arith.mulf %299, %299 : vector<16x64xf32>
    %cst_131 = arith.constant dense<0.000000e+00> : vector<16xf32>
    %309 = vector.multi_reduction <add>, %308, %cst_131 [1] : vector<16x64xf32> to vector<16xf32>
    %310 = vector.shape_cast %309 : vector<16xf32> to vector<16x1xf32>
    %cst_132 = arith.constant 1.562500e-02 : f32
    %311 = vector.broadcast %cst_132 : f32 to vector<16x1xf32>
    %312 = arith.mulf %310, %311 : vector<16x1xf32>
    %313 = arith.mulf %307, %307 : vector<16x1xf32>
    %314 = arith.subf %312, %313 : vector<16x1xf32>
    %cst_133 = arith.constant 0.000000e+00 : f32
    %315 = vector.broadcast %cst_133 : f32 to vector<16x1xf32>
    %316 = arith.maximumf %314, %315 : vector<16x1xf32>
    %317 = vector.broadcast %307 : vector<16x1xf32> to vector<16x64xf32>
    %318 = arith.subf %299, %317 : vector<16x64xf32>
    %cst_134 = arith.constant 9.99999974E-6 : f32
    %319 = vector.broadcast %cst_134 : f32 to vector<16x1xf32>
    %320 = arith.addf %316, %319 : vector<16x1xf32>
    %321 = math.rsqrt %320 : vector<16x1xf32>
    %322 = vector.broadcast %321 : vector<16x1xf32> to vector<16x64xf32>
    %323 = arith.mulf %318, %322 : vector<16x64xf32>
    %324 = vector.broadcast %301 : vector<1x64xf32> to vector<16x64xf32>
    %325 = arith.mulf %323, %324 : vector<16x64xf32>
    %326 = vector.broadcast %303 : vector<1x64xf32> to vector<16x64xf32>
    %327 = arith.addf %325, %326 : vector<16x64xf32>
    %328 = arith.truncf %327 : vector<16x64xf32> to vector<16x64xbf16>
    %c2_135 = arith.constant 2 : index
    %c0_136 = arith.constant 0 : index
    %c0_137 = arith.constant 0 : index
    %329 = vector.load %arg8[%c2_135, %c0_136, %c0_137] : memref<4x64x64xbf16, #tpu.memory_space<vmem>>, vector<1x64x64xbf16>
    %330 = vector.shape_cast %329 : vector<1x64x64xbf16> to vector<64x64xbf16>
    %cst_138 = arith.constant dense<0.000000e+00> : vector<16x64xf32>
    %331 = tpu.matmul %328, %330, %cst_138 {dimension_numbers = #tpu.dot_dimension_numbers<[1], [0], [0], [1], [0, 0, 1, 1], [], []>} : vector<16x64xbf16>, vector<64x64xbf16>, vector<16x64xf32> -> vector<16x64xf32>
    %c2_139 = arith.constant 2 : index
    %c0_140 = arith.constant 0 : index
    %c0_141 = arith.constant 0 : index
    %332 = vector.load %arg9[%c2_139, %c0_140, %c0_141] : memref<4x1x64xf32, #tpu.memory_space<vmem>>, vector<1x1x64xf32>
    %333 = vector.shape_cast %332 : vector<1x1x64xf32> to vector<1x64xf32>
    %334 = vector.broadcast %333 : vector<1x64xf32> to vector<16x64xf32>
    %335 = arith.addf %331, %334 : vector<16x64xf32>
    %cst_142 = arith.constant 0.000000e+00 : f32
    %336 = vector.broadcast %cst_142 : f32 to vector<16x64xf32>
    %337 = arith.maximumf %335, %336 : vector<16x64xf32>
    %338 = arith.truncf %337 : vector<16x64xf32> to vector<16x64xbf16>
    %c3_143 = arith.constant 3 : index
    %c0_144 = arith.constant 0 : index
    %c0_145 = arith.constant 0 : index
    %339 = vector.load %arg8[%c3_143, %c0_144, %c0_145] : memref<4x64x64xbf16, #tpu.memory_space<vmem>>, vector<1x64x64xbf16>
    %340 = vector.shape_cast %339 : vector<1x64x64xbf16> to vector<64x64xbf16>
    %cst_146 = arith.constant dense<0.000000e+00> : vector<16x64xf32>
    %341 = tpu.matmul %338, %340, %cst_146 {dimension_numbers = #tpu.dot_dimension_numbers<[1], [0], [0], [1], [0, 0, 1, 1], [], []>} : vector<16x64xbf16>, vector<64x64xbf16>, vector<16x64xf32> -> vector<16x64xf32>
    %c3_147 = arith.constant 3 : index
    %c0_148 = arith.constant 0 : index
    %c0_149 = arith.constant 0 : index
    %342 = vector.load %arg9[%c3_147, %c0_148, %c0_149] : memref<4x1x64xf32, #tpu.memory_space<vmem>>, vector<1x1x64xf32>
    %343 = vector.shape_cast %342 : vector<1x1x64xf32> to vector<1x64xf32>
    %344 = vector.broadcast %343 : vector<1x64xf32> to vector<16x64xf32>
    %345 = arith.addf %341, %344 : vector<16x64xf32>
    %346 = arith.addf %327, %345 : vector<16x64xf32>
    %c6 = arith.constant 6 : index
    %c0_150 = arith.constant 0 : index
    %c0_151 = arith.constant 0 : index
    %347 = vector.load %arg10[%c6, %c0_150, %c0_151] : memref<8x1x64xf32, #tpu.memory_space<vmem>>, vector<1x1x64xf32>
    %348 = vector.shape_cast %347 : vector<1x1x64xf32> to vector<1x64xf32>
    %c7 = arith.constant 7 : index
    %c0_152 = arith.constant 0 : index
    %c0_153 = arith.constant 0 : index
    %349 = vector.load %arg10[%c7, %c0_152, %c0_153] : memref<8x1x64xf32, #tpu.memory_space<vmem>>, vector<1x1x64xf32>
    %350 = vector.shape_cast %349 : vector<1x1x64xf32> to vector<1x64xf32>
    %cst_154 = arith.constant dense<0.000000e+00> : vector<16xf32>
    %351 = vector.multi_reduction <add>, %346, %cst_154 [1] : vector<16x64xf32> to vector<16xf32>
    %352 = vector.shape_cast %351 : vector<16xf32> to vector<16x1xf32>
    %cst_155 = arith.constant 1.562500e-02 : f32
    %353 = vector.broadcast %cst_155 : f32 to vector<16x1xf32>
    %354 = arith.mulf %352, %353 : vector<16x1xf32>
    %355 = arith.mulf %346, %346 : vector<16x64xf32>
    %cst_156 = arith.constant dense<0.000000e+00> : vector<16xf32>
    %356 = vector.multi_reduction <add>, %355, %cst_156 [1] : vector<16x64xf32> to vector<16xf32>
    %357 = vector.shape_cast %356 : vector<16xf32> to vector<16x1xf32>
    %cst_157 = arith.constant 1.562500e-02 : f32
    %358 = vector.broadcast %cst_157 : f32 to vector<16x1xf32>
    %359 = arith.mulf %357, %358 : vector<16x1xf32>
    %360 = arith.mulf %354, %354 : vector<16x1xf32>
    %361 = arith.subf %359, %360 : vector<16x1xf32>
    %cst_158 = arith.constant 0.000000e+00 : f32
    %362 = vector.broadcast %cst_158 : f32 to vector<16x1xf32>
    %363 = arith.maximumf %361, %362 : vector<16x1xf32>
    %364 = vector.broadcast %354 : vector<16x1xf32> to vector<16x64xf32>
    %365 = arith.subf %346, %364 : vector<16x64xf32>
    %cst_159 = arith.constant 9.99999974E-6 : f32
    %366 = vector.broadcast %cst_159 : f32 to vector<16x1xf32>
    %367 = arith.addf %363, %366 : vector<16x1xf32>
    %368 = math.rsqrt %367 : vector<16x1xf32>
    %369 = vector.broadcast %368 : vector<16x1xf32> to vector<16x64xf32>
    %370 = arith.mulf %365, %369 : vector<16x64xf32>
    %371 = vector.broadcast %348 : vector<1x64xf32> to vector<16x64xf32>
    %372 = arith.mulf %370, %371 : vector<16x64xf32>
    %373 = vector.broadcast %350 : vector<1x64xf32> to vector<16x64xf32>
    %374 = arith.addf %372, %373 : vector<16x64xf32>
    %375 = arith.truncf %374 : vector<16x64xf32> to vector<16x64xbf16>
    %c0_160 = arith.constant 0 : index
    %c0_161 = arith.constant 0 : index
    %376 = vector.load %arg11[%c0_160, %c0_161] : memref<64x128xbf16, #tpu.memory_space<vmem>>, vector<64x128xbf16>
    %cst_162 = arith.constant dense<0.000000e+00> : vector<16x128xf32>
    %377 = tpu.matmul %375, %376, %cst_162 {dimension_numbers = #tpu.dot_dimension_numbers<[1], [0], [0], [1], [0, 0, 1, 1], [], []>} : vector<16x64xbf16>, vector<64x128xbf16>, vector<16x128xf32> -> vector<16x128xf32>
    %c0_163 = arith.constant 0 : index
    %c0_164 = arith.constant 0 : index
    %378 = vector.load %arg12[%c0_163, %c0_164] : memref<1x128xf32, #tpu.memory_space<vmem>>, vector<1x128xf32>
    %379 = vector.broadcast %378 : vector<1x128xf32> to vector<16x128xf32>
    %380 = arith.addf %377, %379 : vector<16x128xf32>
    %c0_165 = arith.constant 0 : index
    %c0_166 = arith.constant 0 : index
    %381 = vector.load %arg14[%c0_165, %c0_166] : memref<16x128xf32, #tpu.memory_space<vmem>>, vector<16x128xf32>
    tpu.vector_store %arg14[%c0_165, %c0_166], %380 {strides = array<i32>} : memref<16x128xf32, #tpu.memory_space<vmem>>, vector<16x128xf32>,
    return
  }
  func.func @transform_0(%arg0: i32) -> (i32, i32) {
    %c0_i32 = arith.constant 0 : i32
    %c0_i32_0 = arith.constant 0 : i32
    return %arg0, %c0_i32 : i32, i32
  }
  func.func @transform_1(%arg0: i32) -> (i32, i32) {
    %c0_i32 = arith.constant 0 : i32
    %c0_i32_0 = arith.constant 0 : i32
    return %arg0, %c0_i32 : i32, i32
  }
  func.func @transform_2(%arg0: i32) -> (i32, i32) {
    %c0_i32 = arith.constant 0 : i32
    %c0_i32_0 = arith.constant 0 : i32
    %c0_i32_1 = arith.constant 0 : i32
    return %c0_i32, %c0_i32_0 : i32, i32
  }
  func.func @transform_3(%arg0: i32) -> (i32, i32, i32) {
    %c0_i32 = arith.constant 0 : i32
    %c0_i32_0 = arith.constant 0 : i32
    %c0_i32_1 = arith.constant 0 : i32
    %c0_i32_2 = arith.constant 0 : i32
    return %c0_i32, %c0_i32_0, %c0_i32_1 : i32, i32, i32
  }
  func.func @transform_4(%arg0: i32) -> (i32, i32, i32) {
    %c0_i32 = arith.constant 0 : i32
    %c0_i32_0 = arith.constant 0 : i32
    %c0_i32_1 = arith.constant 0 : i32
    %c0_i32_2 = arith.constant 0 : i32
    return %c0_i32, %c0_i32_0, %c0_i32_1 : i32, i32, i32
  }
  func.func @transform_5(%arg0: i32) -> (i32, i32, i32) {
    %c0_i32 = arith.constant 0 : i32
    %c0_i32_0 = arith.constant 0 : i32
    %c0_i32_1 = arith.constant 0 : i32
    %c0_i32_2 = arith.constant 0 : i32
    return %c0_i32, %c0_i32_0, %c0_i32_1 : i32, i32, i32
  }
  func.func @transform_6(%arg0: i32) -> (i32, i32, i32) {
    %c0_i32 = arith.constant 0 : i32
    %c0_i32_0 = arith.constant 0 : i32
    %c0_i32_1 = arith.constant 0 : i32
    %c0_i32_2 = arith.constant 0 : i32
    return %c0_i32, %c0_i32_0, %c0_i32_1 : i32, i32, i32
  }
  func.func @transform_7(%arg0: i32) -> (i32, i32, i32) {
    %c0_i32 = arith.constant 0 : i32
    %c0_i32_0 = arith.constant 0 : i32
    %c0_i32_1 = arith.constant 0 : i32
    %c0_i32_2 = arith.constant 0 : i32
    return %c0_i32, %c0_i32_0, %c0_i32_1 : i32, i32, i32
  }
  func.func @transform_8(%arg0: i32) -> (i32, i32, i32) {
    %c0_i32 = arith.constant 0 : i32
    %c0_i32_0 = arith.constant 0 : i32
    %c0_i32_1 = arith.constant 0 : i32
    %c0_i32_2 = arith.constant 0 : i32
    return %c0_i32, %c0_i32_0, %c0_i32_1 : i32, i32, i32
  }
  func.func @transform_9(%arg0: i32) -> (i32, i32, i32) {
    %c0_i32 = arith.constant 0 : i32
    %c0_i32_0 = arith.constant 0 : i32
    %c0_i32_1 = arith.constant 0 : i32
    %c0_i32_2 = arith.constant 0 : i32
    return %c0_i32, %c0_i32_0, %c0_i32_1 : i32, i32, i32
  }
  func.func @transform_10(%arg0: i32) -> (i32, i32) {
    %c0_i32 = arith.constant 0 : i32
    %c0_i32_0 = arith.constant 0 : i32
    %c0_i32_1 = arith.constant 0 : i32
    return %c0_i32, %c0_i32_0 : i32, i32
  }
  func.func @transform_11(%arg0: i32) -> (i32, i32) {
    %c0_i32 = arith.constant 0 : i32
    %c0_i32_0 = arith.constant 0 : i32
    %c0_i32_1 = arith.constant 0 : i32
    return %c0_i32, %c0_i32_0 : i32, i32
  }
  func.func @transform_12(%arg0: i32) -> (i32, i32) {
    %c0_i32 = arith.constant 0 : i32
    %c0_i32_0 = arith.constant 0 : i32
    %c0_i32_1 = arith.constant 0 : i32
    return %c0_i32, %c0_i32_0 : i32, i32
  }
  func.func @transform_13(%arg0: i32) -> (i32, i32) {
    %c0_i32 = arith.constant 0 : i32
    %c0_i32_0 = arith.constant 0 : i32
    return %arg0, %c0_i32 : i32, i32
  }
}

</mosaic_0001>

<bundles_post_ra>
// kernel: denoise_transformer.1
= control target key start
LH: loop header
LB: loop body
LE: loop exit
PB: predicated region body
PF: predicated region fallthrough
CT: control target
= control target key end

     0   :  { %v2839_v0 = vmov 0.0   ;;  %vm2840_vm0 = vmmov 0   ;;  %v2841_v18 = vmov 0   ;;  %vm221_vm1 = vcmask 523264   ;;  %s2842_s28 = smov 64   ;;  %s2843_s29 = smov 112   ;;  %s3444_s2 = inlined_call_operand.vmem [shape: bf16[128,64], index: 2, kind: input, shape index: {}]   ;;  %s3445_s3 = inlined_call_operand.vmem [shape: bf16[2,64,192], index: 3, kind: input, shape index: {}]   ;;  %s3446_s0 = inlined_call_operand.vmem [shape: bf16[16,128], index: 0, kind: input, shape index: {}]   ;;  %s3447_s1 = inlined_call_operand.vmem [shape: f32[16,64], index: 1, kind: input, shape index: {}]   ;;  %s3448_s4 = inlined_call_operand.vmem [shape: f32[2,1,192], index: 4, kind: input, shape index: {}]   ;;  %s3449_s12 = inlined_call_operand.vmem [shape: f32[16,16], index: 12, kind: input, shape index: {}]   ;;  %s3450_s5 = inlined_call_operand.vmem [shape: bf16[2,64,64], index: 5, kind: input, shape index: {}]   ;;  %s3451_s6 = inlined_call_operand.vmem [shape: f32[2,1,64], index: 6, kind: input, shape index: {}]   ;;  %s3452_s7 = inlined_call_operand.vmem [shape: bf16[4,64,64], index: 7, kind: input, shape index: {}]   ;;  %s3453_s9 = inlined_call_operand.vmem [shape: f32[8,1,64], index: 9, kind: input, shape index: {}]   ;;  %s3454_s8 = inlined_call_operand.vmem [shape: f32[4,1,64], index: 8, kind: input, shape index: {}]   ;;  %s3455_s10 = inlined_call_operand.vmem [shape: bf16[64,128], index: 10, kind: input, shape index: {}]   ;;  %s3456_s11 = inlined_call_operand.vmem [shape: f32[1,128], index: 11, kind: input, shape index: {}]   ;;  %s3457_s13 = inlined_call_operand.vmem [shape: f32[16,128], index: 13, kind: output, shape index: {}]  }
   0x1   :  { %2458 = vmatprep.subr.bf16.mxu0 %v2839_v0  ;;  %v2698_v1 = vld [vmem:[%s3444_s2 + $0x38] sm:$0xff]   ;;  %2474 = vmatprep.mubr.msk.bf16.mxu0 %vm2840_vm0, %v2839_v0  ;;  %v2699_v2 = vld [vmem:[%s3444_s2 + $0x30] sm:$0xff]   ;;  %v2700_v3 = vld [vmem:[%s3444_s2 + $0x28] sm:$0xff]   ;;  %v171_v28 = vlaneseq  ;;  %s2844_s30 = smov 48   ;;  %s2845_s14 = smov 32   ;;  %vm277_vm2 = vcmask 130048  }
   0x2   :  { %2459 = vmatpush3.bf16.msra.mxu0 %v2698_v1  ;;  %v2701_v4 = vld [vmem:[%s3444_s2 + $0x20] sm:$0xff]   ;;  %v2707_v5 = vld [vmem:[%s3445_s3 + $0x34] ss:$8 sps:$4 sm:$0xff]   ;;  %v2709_v6 = vld [vmem:[%s3445_s3 + $0x30] ss:$8 sps:$4 sm:$0xff]   ;;  %257 = vmatprep.mubr.bf16.mxu1 %v2841_v18  ;;  %s2846_s15 = smov 96  }
   0x3   :  { %2460 = vmatprep.subr.bf16.mxu0 %v2839_v0  ;;  %233 = vmatprep.subr.bf16.mxu1 %v2707_v5  ;;  %v2710_v7 = vld [vmem:[%s3445_s3 + $0x24] ss:$8 sps:$4 sm:$0xff]   ;;  %v2712_v8 = vld [vmem:[%s3445_s3 + $0x20] ss:$8 sps:$4 sm:$0xff]   ;;  %v2702_v9 = vld [vmem:[%s3444_s2 + $0x18] sm:$0xff]   ;;  %v3000_v29 = vshrl.u32 %v171_v28, 7 }
   0x4   :  { %234 = vmatpush1.bf16.msra.mxu1 %v2709_v6  ;;  %v2703_v10 = vld [vmem:[%s3444_s2 + $0x10] sm:$0xff]   ;;  %v2704_v11 = vld [vmem:[%s3444_s2 + $0x8] sm:$0xff]   ;;  %v2705_v12 = vld [vmem:[%s3444_s2] sm:$0xff]   ;;  %s2847_s16 = smov 16   ;;  %s2848_s17 = smov 80   ;;  %vm784_vm3 = vcmask 261120  }
   0x5   :  { %235 = vmatprep.subr.bf16.mxu1 %v2710_v7  ;;  %v2706_v13 = vld [vmem:[%s3446_s0] sm:$0xff]   ;;  %v2713_v14 = vld [vmem:[%s3445_s3 + $0x14] ss:$8 sps:$4 sm:$0xff]   ;;  %v2715_v15 = vld [vmem:[%s3445_s3 + $0x10] ss:$8 sps:$4 sm:$0xff]   ;;  %v173_v30 = vsub.s32 0, %v3000_v29 }
   0x6   :  { %2461 = vmatpush3.bf16.msra.mxu0 %v2699_v2  ;;  %v2716_v16 = vld [vmem:[%s3445_s3 + $0x4] ss:$8 sps:$4 sm:$0xff]   ;;  %v2718_v17 = vld [vmem:[%s3445_s3] ss:$8 sps:$4 sm:$0xff]   ;;  %v177_v42 = vsub.s32 1, %v3000_v29  ;;  %vm787_vm4 = vcmask 392192  }
   0x7   :  { %2462 = vmatprep.subr.bf16.mxu0 %v2839_v0  ;;  %v63_v20 = vld [vmem:[%s3447_s1] sm:$0xff]  ;;  %v64_v22 = vld [vmem:[%s3447_s1 + $0x8] sm:$0xff] }
   0x8   :  { %236 = vmatpush1.bf16.msra.mxu1 %v2712_v8  ;;  %v169_v31 = vld [vmem:[%s3448_s4] sm:$0x3]  ;;  %v3051_v63 = vld [vmem:[%s3449_s12 + $0x8] sm:$0xff] }
   0x9   :  { %237 = vmatprep.subr.bf16.mxu1 %v2713_v14  ;;  %v174_v32 = vrot.slane %v169_v31, %v173_v30  ;;  %v178_v46 = vrot.slane %v169_v31, %v177_v42  ;;  %v3045_v59 = vld [vmem:[%s3449_s12] sm:$0xff] }
   0xa   :  { %2463 = vmatpush3.bf16.msra.mxu0 %v2700_v3 }
   0xb   :  { %2464 = vmatprep.subr.bf16.mxu0 %v2839_v0 }
   0xc   :  { %238 = vmatpush1.bf16.msra.mxu1 %v2715_v15 }
   0xd   :  { %239 = vmatprep.subr.bf16.mxu1 %v2716_v16 }
   0xe   :  { %2465 = vmatpush3.bf16.msra.mxu0 %v2701_v4 }
   0xf   :  { %2466 = vmatprep.subr.bf16.mxu0 %v2839_v0 }
  0x10   :  { %240 = vmatpush1.bf16.msra.mxu1 %v2718_v17 }
  0x11   :  { %2478 = vmatprep.subr.bf16.mxu1 %v2839_v0 }
  0x12   :  { %2467 = vmatpush3.bf16.msra.mxu0 %v2702_v9 }
  0x13   :  { %2468 = vmatprep.subr.bf16.mxu0 %v2839_v0 }
  0x16   :  { %2469 = vmatpush3.bf16.msra.mxu0 %v2703_v10 }
  0x17   :  { %2470 = vmatprep.subr.bf16.mxu0 %v2839_v0 }
  0x1a   :  { %2471 = vmatpush3.bf16.msra.mxu0 %v2704_v11 }
  0x1b   :  { %2472 = vmatprep.subr.bf16.mxu0 %v2839_v0 }
  0x1e   :  { %2473 = vmatpush3.bf16.msra.mxu0 %v2705_v12 }
  0x1f   :  { %2490 = vmatprep.subr.bf16.mxu0 %v2839_v0 }
  0x21   :  { %2475 = vmatmul.mubr.bf16.vlgmr.msra.gmra.mxu0 %v2706_v13 }
  0x22   :  { %2492 = vmatprep.mubr.msk.bf16.mxu0 %vm2840_vm0, %v2839_v0 }
  0xe1   :  { %v153_v19 = vpop.f32.mrf.mxu0 }
  0xe2   :  { %v2991_v24 = vadd.f32 %v153_v19, %v63_v20 }
  0xe3   :  { %v2476_v21 = vpop.f32.mrf.mxu0 }
  0xe5   :  { %v156_v23 = vpop.f32.mrf.mxu0 }
  0xe6   :  { %v2993_v25 = vadd.f32 %v156_v23, %v64_v22 }
  0xe7   :  { %v2477_v26 = vpop.f32.mrf.mxu0 }
  0xe8   :  { %v160_v27 = vpack.c.bf16 %v2993_v25, %v2991_v24 }
  0xea   :  { %2254 = vmatmul.mubr.msk.bf16.vlgmr.msra.gmra.mxu1 %vm221_vm1, %v160_v27 }
  0xeb   :  { %2480 = vmatprep.mubr.msk.bf16.mxu1 %vm2840_vm0, %v2839_v0 }
 0x1aa   :  { %v259_v33 = vpop.f32.mrf.mxu1 }
 0x1ab   :  { %v260_v35 = vadd.f32 %v259_v33, %v174_v32 }
 0x1ac   :  { %v261_v34 = vpop.f32.mrf.mxu1 }
 0x1ad   :  { %v268_v38 = vmul.f32 0.25, %v260_v35  ;;  %v262_v51 = vadd.f32 %v261_v34, %v178_v46 }
 0x1ae   :  { %v263_v36 = vpop.f32.mrf.mxu1 }
 0x1af   :  { %v264_v37 = vadd.f32 %v263_v36, %v174_v32 }
 0x1b0   :  { %v265_v44 = vpop.f32.mrf.mxu1 }
 0x1b1   :  { %v269_v39 = vmul.f32 0.25, %v264_v37  ;;  %v271_v40 = vpack.c.bf16 %v264_v37, %v260_v35  ;;  %v266_v47 = vadd.f32 %v265_v44, %v178_v46 }
 0x1b3   :  { %v270_v41 = vpack.c.bf16 %v269_v39, %v268_v38  ;;  %275 = vrot.lane.b32.xlu0 %v271_v40, %s2842_s28  ;;  %v3022_v52 = vpack.c.bf16 %v266_v47, %v262_v51 }
 0x1b5   :  { %394 = vrot.lane.b32.xlu1 %v270_v41, %s2843_s29 }
 0x1b7   :  { %396 = vrot.lane.b32.xlu0 %v271_v40, %s2844_s30 }
 0x1b9   :  { %518 = vrot.lane.b32.xlu1 %v271_v40, %s2845_s14 }
 0x1bb   :  { %516 = vrot.lane.b32.xlu0 %v270_v41, %s2846_s15 }
 0x1bd   :  { %639 = vrot.lane.b32.xlu1 %v271_v40, %s2847_s16 }
 0x1bf   :  { %637 = vrot.lane.b32.xlu0 %v270_v41, %s2848_s17 }
 0x225   :  { %v276_v43 = vpop.permute.xlu0 %275 }
 0x226   :  { %v282_v45 = vsel %vm277_vm2, %v276_v43, 0 }
 0x227   :  { %2479 = vmatpush3.bf16.xpose.msra.mxu1 %v282_v45  ;;  %v395_v48 = vpop.permute.xlu1 %394 }
 0x228   :  { %2484 = vmatprep.subr.bf16.mxu1 %v2839_v0 }
 0x229   :  { %v397_v49 = vpop.permute.xlu0 %396 }
 0x22a   :  { %v402_v50 = vsel %vm277_vm2, %v397_v49, 0 }
 0x22b   :  { %2491 = vmatpush3.bf16.xpose.msra.mxu0 %v402_v50  ;;  %v519_v53 = vpop.permute.xlu1 %518 }
 0x22c   :  { %2502 = vmatprep.subr.bf16.mxu0 %v2839_v0  ;;  %v524_v54 = vsel %vm277_vm2, %v519_v53, 0 }
 0x22d   :  { %v517_v56 = vpop.permute.xlu0 %516 }
 0x22e   :  { %2481 = vmatmul.mubr.msk.bf16.vlgmr.msra.gmra.mxu1 %vm277_vm2, %v270_v41 }
 0x22f   :  { %2485 = vmatpush3.bf16.msra.mxu1 %v3022_v52  ;;  %2486 = vmatprep.mubr.msk.bf16.mxu1 %vm2840_vm0, %v2839_v0  ;;  %v640_v55 = vpop.permute.xlu1 %639 }
 0x230   :  { %2496 = vmatprep.subr.bf16.mxu1 %v2839_v0  ;;  %v645_v57 = vsel %vm277_vm2, %v640_v55, 0 }
 0x231   :  { %v638_v58 = vpop.permute.xlu0 %637 }
 0x232   :  { %2493 = vmatmul.mubr.msk.bf16.vlgmr.msra.gmra.mxu0 %vm277_vm2, %v395_v48 }
 0x233   :  { %2503 = vmatpush3.bf16.xpose.msra.mxu0 %v524_v54  ;;  %2504 = vmatprep.mubr.msk.bf16.mxu0 %vm2840_vm0, %v2839_v0 }
 0x234   :  { %2514 = vmatprep.subr.bf16.mxu0 %v2839_v0 }
 0x23a   :  { %2505 = vmatmul.mubr.msk.bf16.vlgmr.msra.gmra.mxu0 %vm277_vm2, %v517_v56 }
 0x23b   :  { %2515 = vmatpush3.bf16.xpose.msra.mxu0 %v645_v57  ;;  %2516 = vmatprep.mubr.msk.bf16.mxu0 %vm2840_vm0, %v2839_v0 }
 0x23c   :  { %2526 = vmatprep.subr.bf16.mxu0 %v2839_v0 }
 0x242   :  { %2517 = vmatmul.mubr.msk.bf16.vlgmr.msra.gmra.mxu0 %vm277_vm2, %v638_v58 }
 0x243   :  { %2534 = vmatprep.mubr.msk.bf16.mxu0 %vm2840_vm0, %v2839_v0 }
 0x2ee   :  { %v318_v60 = vpop.f32.mrf.mxu1 }
 0x2ef   :  { %v319_v61 = vadd.f32 %v318_v60, %v3045_v59 }
 0x2f0   :  { %v2482_v62 = vpop.f32.mrf.mxu1 }
 0x2f1   :  { %v325_v1 = vsel %vm277_vm2, %v319_v61, -inf }
 0x2f2   :  { %326 = vmax.xlane.f32.xlu1 %v325_v1  ;;  %v321_v2 = vpop.f32.mrf.mxu1  ;;  %v438_v3 = vpop.f32.mrf.mxu0 }
 0x2f3   :  { %v322_v4 = vadd.f32 %v321_v2, %v3051_v63  ;;  %v439_v7 = vadd.f32 %v438_v3, %v3045_v59 }
 0x2f4   :  { %v2483_v5 = vpop.f32.mrf.mxu1  ;;  %v2494_v6 = vpop.f32.mrf.mxu0 }
 0x2f5   :  { %v328_v8 = vsel %vm277_vm2, %v322_v4, -inf  ;;  %v445_v12 = vsel %vm277_vm2, %v439_v7, -inf }
 0x2f6   :  { %329 = vmax.xlane.f32.xlu0 %v328_v8  ;;  %v441_v9 = vpop.f32.mrf.mxu0 }
 0x2f7   :  { %v442_v10 = vadd.f32 %v441_v9, %v3051_v63 }
 0x2f8   :  { %v2495_v11 = vpop.f32.mrf.mxu0 }
 0x2f9   :  { %v448_v13 = vsel %vm277_vm2, %v442_v10, -inf }
 0x2fa   :  { %446 = vmax.xlane.f32.xlu0 %v445_v12  ;;  %449 = vmax.xlane.f32.xlu1 %v448_v13  ;;  %v560_v14 = vpop.f32.mrf.mxu0 }
 0x2fb   :  { %v561_v15 = vadd.f32 %v560_v14, %v3045_v59 }
 0x2fc   :  { %v2506_v16 = vpop.f32.mrf.mxu0 }
 0x2fd   :  { %v567_v17 = vsel %vm277_vm2, %v561_v15, -inf }
 0x2fe   :  { %568 = vmax.xlane.f32.xlu0 %v567_v17  ;;  %v563_v19 = vpop.f32.mrf.mxu0 }
 0x2ff   :  { %v564_v20 = vadd.f32 %v563_v19, %v3051_v63 }
 0x300   :  { %v2507_v21 = vpop.f32.mrf.mxu0 }
 0x301   :  { %v570_v22 = vsel %vm277_vm2, %v564_v20, -inf }
 0x302   :  { %571 = vmax.xlane.f32.xlu1 %v570_v22  ;;  %v681_v23 = vpop.f32.mrf.mxu0 }
 0x303   :  { %v682_v26 = vadd.f32 %v681_v23, %v3045_v59 }
 0x304   :  { %v2518_v27 = vpop.f32.mrf.mxu0 }
 0x305   :  { %v688_v28 = vsel %vm277_vm2, %v682_v26, -inf }
 0x306   :  { %689 = vmax.xlane.f32.xlu0 %v688_v28  ;;  %v684_v31 = vpop.f32.mrf.mxu0 }
 0x307   :  { %v685_v32 = vadd.f32 %v684_v31, %v3051_v63 }
 0x308   :  { %v2519_v33 = vpop.f32.mrf.mxu0 }
 0x309   :  { %v691_v34 = vsel %vm277_vm2, %v685_v32, -inf }
 0x30a   :  { %692 = vmax.xlane.f32.xlu1 %v691_v34 }
 0x37b   :  { %v327_v35 = vpop.xlane.xlu1 %326 }
 0x37c   :  { %v331_v36 = vsub.f32 %v319_v61, %v327_v35 }
 0x37e   :  { %v333_v37 = vmul.f32 1.442695, %v331_v36 }
 0x37f   :  { %v330_v38 = vpop.xlane.xlu0 %329 }
 0x380   :  { %2759 = vpow2.f32 %v333_v37  ;;  %v332_v39 = vsub.f32 %v322_v4, %v330_v38 }
 0x382   :  { %v335_v40 = vmul.f32 1.442695, %v332_v39 }
 0x383   :  { %v447_v41 = vpop.xlane.xlu0 %446  ;;  %v450_v43 = vpop.xlane.xlu1 %449 }
 0x384   :  { %2761 = vpow2.f32 %v335_v40  ;;  %v451_v44 = vsub.f32 %v439_v7, %v447_v41  ;;  %v452_v45 = vsub.f32 %v442_v10, %v450_v43 }
 0x386   :  { %v453_v46 = vmul.f32 1.442695, %v451_v44  ;;  %v455_v47 = vmul.f32 1.442695, %v452_v45 }
 0x387   :  { %v569_v48 = vpop.xlane.xlu0 %568 }
 0x388   :  { %2763 = vpow2.f32 %v453_v46  ;;  %v573_v49 = vsub.f32 %v561_v15, %v569_v48 }
 0x389   :  { %2765 = vpow2.f32 %v455_v47 }
 0x38a   :  { %v575_v50 = vmul.f32 1.442695, %v573_v49 }
 0x38b   :  { %v572_v51 = vpop.xlane.xlu1 %571 }
 0x38c   :  { %2767 = vpow2.f32 %v575_v50  ;;  %v574_v53 = vsub.f32 %v564_v20, %v572_v51 }
 0x38d   :  { %v2760_v54 = vpop.eup %2759 }
 0x38e   :  { %v577_v55 = vmul.f32 1.442695, %v574_v53  ;;  %v337_v56 = vsel %vm277_vm2, %v2760_v54, 0.0 }
 0x38f   :  { %338 = vadd.xlane.f32.xlu0 %v337_v56  ;;  %v690_v57 = vpop.xlane.xlu0 %689 }
 0x390   :  { %2769 = vpow2.f32 %v577_v55  ;;  %v694_v58 = vsub.f32 %v682_v26, %v690_v57 }
 0x391   :  { %v2762_v60 = vpop.eup %2761 }
 0x392   :  { %v696_v61 = vmul.f32 1.442695, %v694_v58  ;;  %v340_v62 = vsel %vm277_vm2, %v2762_v60, 0.0 }
 0x393   :  { %341 = vadd.xlane.f32.xlu1 %v340_v62  ;;  %v693_v11 = vpop.xlane.xlu1 %692  ;;  %v2719_v62 = vld [vmem:[%s3450_s5 + $0x18] sm:$0xff]  }
 0x394   :  { %2771 = vpow2.f32 %v696_v61  ;;  %v695_v12 = vsub.f32 %v685_v32, %v693_v11  ;;  %2527 = vmatpush3.bf16.msra.mxu0 %v2719_v62 }
 0x395   :  { %v2764_v1 = vpop.eup %2763  ;;  %2528 = vmatprep.subr.bf16.mxu0 %v2839_v0 }
 0x396   :  { %v2766_v2 = vpop.eup %2765  ;;  %v457_v3 = vsel %vm277_vm2, %v2764_v1, 0.0  ;;  %v698_v13 = vmul.f32 1.442695, %v695_v12 }
 0x397   :  { %458 = vadd.xlane.f32.xlu0 %v457_v3  ;;  %v460_v4 = vsel %vm277_vm2, %v2766_v2, 0.0 }
 0x398   :  { %461 = vadd.xlane.f32.xlu1 %v460_v4  ;;  %2773 = vpow2.f32 %v698_v13 }
 0x399   :  { %v2768_v5 = vpop.eup %2767 }
 0x39a   :  { %v579_v6 = vsel %vm277_vm2, %v2768_v5, 0.0 }
 0x39b   :  { %580 = vadd.xlane.f32.xlu0 %v579_v6 }
 0x39d   :  { %v2770_v7 = vpop.eup %2769 }
 0x39e   :  { %v582_v8 = vsel %vm277_vm2, %v2770_v7, 0.0 }
 0x39f   :  { %583 = vadd.xlane.f32.xlu1 %v582_v8 }
 0x3a1   :  { %v2772_v9 = vpop.eup %2771 }
 0x3a2   :  { %v700_v10 = vsel %vm277_vm2, %v2772_v9, 0.0 }
 0x3a3   :  { %701 = vadd.xlane.f32.xlu0 %v700_v10 }
 0x3a5   :  { %v2774_v14 = vpop.eup %2773 }
 0x3a6   :  { %v703_v15 = vsel %vm277_vm2, %v2774_v14, 0.0 }
 0x3b0   :  { %590 = vrot.lane.b32.xlu1 %v3022_v52, %s2846_s15 }
 0x3b9   :  { %469 = vrot.lane.b32.xlu0 %v3022_v52, %s2843_s29 }
 0x3d4   :  { %704 = vadd.xlane.f32.xlu1 %v703_v15 }
 0x3e5   :  { %711 = vrot.lane.b32.xlu1 %v3022_v52, %s2848_s17 }
 0x418   :  { %v339_v16 = vpop.xlane.xlu0 %338 }
 0x419   :  { %2775 = vrcp.f32 %v339_v16 }
 0x41c   :  { %v342_v17 = vpop.xlane.xlu1 %341 }
 0x41d   :  { %2777 = vrcp.f32 %v342_v17 }
 0x420   :  { %v459_v19 = vpop.xlane.xlu0 %458 }
 0x421   :  { %2779 = vrcp.f32 %v459_v19  ;;  %v462_v20 = vpop.xlane.xlu1 %461 }
 0x422   :  { %2781 = vrcp.f32 %v462_v20 }
 0x424   :  { %v581_v22 = vpop.xlane.xlu0 %580 }
 0x426   :  { %v2776_v21 = vpop.eup %2775 }
 0x427   :  { %v345_v27 = vmul.f32 %v2776_v21, %v2760_v54 }
 0x428   :  { %v584_v23 = vpop.xlane.xlu1 %583 }
 0x429   :  { %2783 = vrcp.f32 %v584_v23 }
 0x42a   :  { %v2778_v26 = vpop.eup %2777  ;;  %2785 = vrcp.f32 %v581_v22 }
 0x42b   :  { %v346_v28 = vmul.f32 %v2778_v26, %v2762_v60 }
 0x42c   :  { %v702_v31 = vpop.xlane.xlu0 %701  ;;  %v591_v39 = vpop.permute.xlu1 %590 }
 0x42d   :  { %v347_v32 = vpack.c.bf16 %v346_v28, %v345_v27  ;;  %2787 = vrcp.f32 %v702_v31 }
 0x42e   :  { %v2780_v33 = vpop.eup %2779 }
 0x42f   :  { %v2782_v52 = vpop.eup %2781  ;;  %2487 = vmatmul.mubr.msk.bf16.vlgmr.msra.gmra.mxu1 %vm277_vm2, %v347_v32  ;;  %v465_v35 = vmul.f32 %v2780_v33, %v2764_v1 }
 0x430   :  { %v470_v34 = vpop.permute.xlu0 %469  ;;  %2498 = vmatprep.mubr.msk.bf16.mxu1 %vm2840_vm0, %v2839_v0  ;;  %v466_v36 = vmul.f32 %v2782_v52, %v2766_v2  ;;  %v2720_v2 = vld [vmem:[%s3450_s5 + $0x10] sm:$0xff]  }
 0x431   :  { %2497 = vmatpush3.bf16.msra.mxu1 %v470_v34  ;;  %2529 = vmatpush3.bf16.msra.mxu0 %v2720_v2 }
 0x432   :  { %2508 = vmatprep.subr.bf16.mxu1 %v2839_v0  ;;  %v467_v37 = vpack.c.bf16 %v466_v36, %v465_v35  ;;  %2530 = vmatprep.subr.bf16.mxu0 %v2839_v0  ;;  %v2263_v35 = vld [vmem:[%s3451_s6] ss:$0 sm:$0xff] }
 0x436   :  { %v2784_v38 = vpop.eup %2783 }
 0x437   :  { %2499 = vmatmul.mubr.msk.bf16.vlgmr.msra.gmra.mxu1 %vm277_vm2, %v467_v37  ;;  %v2786_v40 = vpop.eup %2785  ;;  %v588_v41 = vmul.f32 %v2784_v38, %v2770_v7 }
 0x438   :  { %2509 = vmatpush3.bf16.msra.mxu1 %v591_v39  ;;  %2510 = vmatprep.mubr.msk.bf16.mxu1 %vm2840_vm0, %v2839_v0  ;;  %v587_v43 = vmul.f32 %v2786_v40, %v2768_v5  ;;  %v2721_v5 = vld [vmem:[%s3450_s5 + $0x8] sm:$0xff]  }
 0x439   :  { %2520 = vmatprep.subr.bf16.mxu1 %v2839_v0  ;;  %2531 = vmatpush3.bf16.msra.mxu0 %v2721_v5 }
 0x43a   :  { %v589_v44 = vpack.c.bf16 %v588_v41, %v587_v43  ;;  %v2788_v47 = vpop.eup %2787  ;;  %2532 = vmatprep.subr.bf16.mxu0 %v2839_v0 }
 0x43b   :  { %v708_v49 = vmul.f32 %v2788_v47, %v2772_v9  ;;  %v2722_v9 = vld [vmem:[%s3450_s5] sm:$0xff]  }
 0x43d   :  { %2533 = vmatpush3.bf16.msra.mxu0 %v2722_v9 }
 0x43e   :  { %2550 = vmatprep.subr.bf16.mxu0 %v2839_v0 }
 0x43f   :  { %2511 = vmatmul.mubr.msk.bf16.vlgmr.msra.gmra.mxu1 %vm277_vm2, %v589_v44 }
 0x440   :  { %2522 = vmatprep.mubr.msk.bf16.mxu1 %vm2840_vm0, %v2839_v0 }
 0x45d   :  { %v705_v45 = vpop.xlane.xlu1 %704 }
 0x45e   :  { %2789 = vrcp.f32 %v705_v45 }
 0x461   :  { %v712_v46 = vpop.permute.xlu1 %711 }
 0x462   :  { %2521 = vmatpush3.bf16.msra.mxu1 %v712_v46 }
 0x463   :  { %2538 = vmatprep.subr.bf16.mxu1 %v2839_v0 }
 0x46b   :  { %v2790_v48 = vpop.eup %2789 }
 0x46c   :  { %v709_v50 = vmul.f32 %v2790_v48, %v2774_v14 }
 0x46e   :  { %v710_v51 = vpack.c.bf16 %v709_v50, %v708_v49 }
 0x470   :  { %2523 = vmatmul.mubr.msk.bf16.vlgmr.msra.gmra.mxu1 %vm277_vm2, %v710_v51  ;;  %v2725_v51 = vld [vmem:[%s3452_s7 + $0x8] sm:$0xff]  }
 0x471   :  { %2546 = vmatprep.mubr.msk.bf16.mxu1 %vm2840_vm0, %v2839_v0 }
 0x4ef   :  { %v386_v53 = vpop.f32.mrf.mxu1 }
 0x4f1   :  { %v2488_v54 = vpop.f32.mrf.mxu1 }
 0x4f2   :  { %v2727_v54 = vld [vmem:[%s3452_s7 + $0x38] sm:$0xff]  }
 0x4f3   :  { %v389_v55 = vpop.f32.mrf.mxu1 }
 0x4f5   :  { %v2489_v56 = vpop.f32.mrf.mxu1 }
 0x4f7   :  { %v509_v57 = vpop.f32.mrf.mxu1 }
 0x4f9   :  { %v2500_v58 = vpop.f32.mrf.mxu1 }
 0x4fb   :  { %v512_v60 = vpop.f32.mrf.mxu1 }
 0x4fc   :  { %v2668_v61 = vpack.i.bf16 %v512_v60, %v509_v57 }
 0x4fd   :  { %v2501_v1 = vpop.f32.mrf.mxu1 }
 0x4fe   :  { %2669 = vrot.lane.b32.xlu0 %v2668_v61, %s2847_s16 }
 0x4ff   :  { %v630_v3 = vpop.f32.mrf.mxu1 }
 0x501   :  { %v2512_v4 = vpop.f32.mrf.mxu1 }
 0x503   :  { %v633_v6 = vpop.f32.mrf.mxu1 }
 0x504   :  { %v2673_v7 = vpack.i.bf16 %v633_v6, %v630_v3 }
 0x505   :  { %v2513_v8 = vpop.f32.mrf.mxu1 }
 0x506   :  { %2674 = vrot.lane.b32.xlu1 %v2673_v7, %s2845_s14 }
 0x530   :  { %v751_v10 = vpop.f32.mrf.mxu1 }
 0x532   :  { %v2524_v11 = vpop.f32.mrf.mxu1 }
 0x534   :  { %v754_v12 = vpop.f32.mrf.mxu1 }
 0x535   :  { %v2678_v13 = vpack.i.bf16 %v754_v12, %v751_v10  ;;  %v2270_v12 = vld [vmem:[%s3453_s9] ss:$0 sm:$0xff] }
 0x536   :  { %v2525_v14 = vpop.f32.mrf.mxu1 }
 0x537   :  { %2679 = vrot.lane.b32.xlu0 %v2678_v13, %s2844_s30 }
 0x570   :  { %v2670_v15 = vpop.permute.xlu0 %2669 }
 0x571   :  { %v2672_v17 = vunpack.i.h.bf16 %v2670_v15  ;;  %v2671_v19 = vunpack.i.l.bf16 %v2670_v15 }
 0x573   :  { %v783_v23 = vsel %vm277_vm2, %v389_v55, %v2672_v17  ;;  %v782_v26 = vsel %vm277_vm2, %v386_v53, %v2671_v19  ;;  %v2726_v53 = vld [vmem:[%s3452_s7] sm:$0xff]  }
 0x574   :  { %v2271_v19 = vld [vmem:[%s3453_s9 + $0x1] ss:$0 sm:$0xff] }
 0x578   :  { %v2675_v16 = vpop.permute.xlu1 %2674 }
 0x579   :  { %v2677_v20 = vunpack.i.h.bf16 %v2675_v16  ;;  %v2676_v21 = vunpack.i.l.bf16 %v2675_v16 }
 0x57b   :  { %v786_v31 = vsel %vm784_vm3, %v783_v23, %v2677_v20  ;;  %v785_v32 = vsel %vm784_vm3, %v782_v26, %v2676_v21  ;;  %v2728_v26 = vld [vmem:[%s3452_s7 + $0x30] sm:$0xff]  }
 0x5a9   :  { %v2680_v22 = vpop.permute.xlu0 %2679 }
 0x5aa   :  { %v2682_v27 = vunpack.i.h.bf16 %v2680_v22  ;;  %v2681_v28 = vunpack.i.l.bf16 %v2680_v22 }
 0x5ac   :  { %v788_v33 = vsel %vm787_vm4, %v785_v32, %v2681_v28  ;;  %v789_v52 = vsel %vm787_vm4, %v786_v31, %v2682_v27  ;;  %v2729_v27 = vld [vmem:[%s3452_s7 + $0x28] sm:$0xff]   ;;  %v2730_v28 = vld [vmem:[%s3452_s7 + $0x20] sm:$0xff]  }
 0x5ad   :  { %v790_v34 = vpack.c.bf16 %v789_v52, %v788_v33 }
 0x5af   :  { %2535 = vmatmul.mubr.msk.bf16.vlgmr.msra.gmra.mxu0 %vm221_vm1, %v790_v34 }
 0x5b0   :  { %2558 = vmatprep.mubr.msk.bf16.mxu0 %vm2840_vm0, %v2839_v0  ;;  %2551 = vmatpush3.bf16.msra.mxu0 %v2727_v54  ;;  %v2731_v54 = vld [vmem:[%s3445_s3 + $0x70] ss:$8 sps:$4 sm:$0xff]  }
 0x5b1   :  { %2552 = vmatprep.subr.bf16.mxu0 %v2839_v0 }
 0x5b4   :  { %2553 = vmatpush3.bf16.msra.mxu0 %v2728_v26 }
 0x5b5   :  { %2554 = vmatprep.subr.bf16.mxu0 %v2839_v0 }
 0x5b8   :  { %2555 = vmatpush3.bf16.msra.mxu0 %v2729_v27 }
 0x5b9   :  { %2556 = vmatprep.subr.bf16.mxu0 %v2839_v0 }
 0x5bc   :  { %2557 = vmatpush3.bf16.msra.mxu0 %v2730_v28  ;;  %v2296_v28 = vld [vmem:[%s3453_s9 + $0x3] ss:$0 sm:$0xff] }
 0x5bd   :  { %2562 = vmatprep.subr.bf16.mxu0 %v2839_v0 }
 0x66f   :  { %v867_v36 = vpop.f32.mrf.mxu0 }
 0x670   :  { %v868_v37 = vadd.f32 %v2263_v35, %v867_v36 }
 0x671   :  { %v2536_v38 = vpop.f32.mrf.mxu0 }
 0x672   :  { %v874_v39 = vadd.f32 %v868_v37, %v2991_v24  ;;  %v2723_v24 = vld [vmem:[%s3452_s7 + $0x18] sm:$0xff]  }
 0x673   :  { %v870_v40 = vpop.f32.mrf.mxu0  ;;  %2539 = vmatpush3.bf16.msra.mxu1 %v2723_v24 }
 0x674   :  { %v871_v41 = vadd.f32 %v2263_v35, %v870_v40  ;;  %v879_v43 = vsel %vm221_vm1, %v874_v39, 0.0  ;;  %v887_v48 = vmul.f32 %v874_v39, %v874_v39  ;;  %2540 = vmatprep.subr.bf16.mxu1 %v2839_v0 }
 0x675   :  { %880 = vadd.xlane.f32.xlu1 %v879_v43  ;;  %v2537_v44 = vpop.f32.mrf.mxu0 }
 0x676   :  { %v875_v45 = vadd.f32 %v871_v41, %v2993_v25  ;;  %v889_v50 = vsel %vm221_vm1, %v887_v48, 0.0  ;;  %v2724_v25 = vld [vmem:[%s3452_s7 + $0x10] sm:$0xff]  }
 0x677   :  { %2541 = vmatpush3.bf16.msra.mxu1 %v2724_v25 }
 0x678   :  { %v882_v46 = vsel %vm221_vm1, %v875_v45, 0.0  ;;  %v888_v47 = vmul.f32 %v875_v45, %v875_v45  ;;  %2542 = vmatprep.subr.bf16.mxu1 %v2839_v0 }
 0x679   :  { %883 = vadd.xlane.f32.xlu0 %v882_v46 }
 0x67a   :  { %v892_v49 = vsel %vm221_vm1, %v888_v47, 0.0 }
 0x67b   :  { %893 = vadd.xlane.f32.xlu1 %v892_v49  ;;  %2543 = vmatpush3.bf16.msra.mxu1 %v2725_v51 }
 0x67c   :  { %2544 = vmatprep.subr.bf16.mxu1 %v2839_v0 }
 0x67d   :  { %890 = vadd.xlane.f32.xlu0 %v889_v50 }
 0x67f   :  { %2545 = vmatpush3.bf16.msra.mxu1 %v2726_v53 }
 0x6fe   :  { %v881_v55 = vpop.xlane.xlu1 %880 }
 0x6ff   :  { %v885_v57 = vmul.f32 0.015625, %v881_v55  ;;  %v2733_v55 = vld [vmem:[%s3445_s3 + $0x74] ss:$8 sps:$4 sm:$0xff]  }
 0x700   :  { %1227 = vmatprep.subr.bf16.mxu1 %v2733_v55 }
 0x701   :  { %v897_v2 = vmul.f32 %v885_v57, %v885_v57  ;;  %v903_v13 = vsub.f32 %v874_v39, %v885_v57  ;;  %v2287_v39 = vld [vmem:[%s3454_s8 + $0x1] ss:$0 sm:$0xff] }
 0x702   :  { %v884_v56 = vpop.xlane.xlu0 %883  ;;  %v2734_v57 = vld [vmem:[%s3445_s3 + $0x60] ss:$8 sps:$4 sm:$0xff]  }
 0x703   :  { %v886_v58 = vmul.f32 0.015625, %v884_v56  ;;  %v2736_v56 = vld [vmem:[%s3445_s3 + $0x64] ss:$8 sps:$4 sm:$0xff]  }
 0x704   :  { %v894_v60 = vpop.xlane.xlu1 %893 }
 0x705   :  { %v898_v61 = vmul.f32 %v886_v58, %v886_v58  ;;  %v896_v62 = vmul.f32 0.015625, %v894_v60  ;;  %v904_v10 = vsub.f32 %v875_v45, %v886_v58  ;;  %v2739_v58 = vld [vmem:[%s3445_s3 + $0x54] ss:$8 sps:$4 sm:$0xff]   ;;  %v2737_v60 = vld [vmem:[%s3445_s3 + $0x50] ss:$8 sps:$4 sm:$0xff]  }
 0x706   :  { %v891_v1 = vpop.xlane.xlu0 %890 }
 0x707   :  { %v900_v3 = vsub.f32 %v896_v62, %v898_v61  ;;  %v895_v4 = vmul.f32 0.015625, %v891_v1  ;;  %v2742_v61 = vld [vmem:[%s3445_s3 + $0x44] ss:$8 sps:$4 sm:$0xff]   ;;  %v2740_v62 = vld [vmem:[%s3445_s3 + $0x40] ss:$8 sps:$4 sm:$0xff]  }
 0x709   :  { %v902_v5 = vmax.f32 %v900_v3, 0.0  ;;  %v899_v6 = vsub.f32 %v895_v4, %v897_v2 }
 0x70b   :  { %v906_v7 = vadd.f32 1e-05, %v902_v5  ;;  %v901_v8 = vmax.f32 %v899_v6, 0.0 }
 0x70d   :  { %2791 = vrsqrt.f32 %v906_v7  ;;  %v905_v9 = vadd.f32 1e-05, %v901_v8 }
 0x70f   :  { %2793 = vrsqrt.f32 %v905_v9 }
 0x71a   :  { %v2792_v11 = vpop.eup %2791 }
 0x71b   :  { %v910_v14 = vmul.f32 %v2792_v11, %v904_v10 }
 0x71c   :  { %v2794_v15 = vpop.eup %2793 }
 0x71d   :  { %v909_v16 = vmul.f32 %v2794_v15, %v903_v13  ;;  %v918_v17 = vmul.f32 %v2270_v12, %v910_v14 }
 0x71f   :  { %v917_v20 = vmul.f32 %v2270_v12, %v909_v16  ;;  %v926_v22 = vadd.f32 %v2271_v19, %v918_v17 }
 0x721   :  { %v925_v21 = vadd.f32 %v2271_v19, %v917_v20 }
 0x723   :  { %v927_v23 = vpack.c.bf16 %v926_v22, %v925_v21 }
 0x725   :  { %2547 = vmatmul.mubr.msk.bf16.vlgmr.msra.gmra.mxu1 %vm221_vm1, %v927_v23 }
 0x726   :  { %1251 = vmatprep.mubr.bf16.mxu1 %v2841_v18  ;;  %v2272_v18 = vld [vmem:[%s3454_s8] ss:$0 sm:$0xff]  ;;  %1228 = vmatpush1.bf16.msra.mxu1 %v2731_v54 }
 0x727   :  { %1229 = vmatprep.subr.bf16.mxu1 %v2736_v56 }
 0x72a   :  { %1230 = vmatpush1.bf16.msra.mxu1 %v2734_v57 }
 0x72b   :  { %1231 = vmatprep.subr.bf16.mxu1 %v2739_v58 }
 0x72e   :  { %1232 = vmatpush1.bf16.msra.mxu1 %v2737_v60 }
 0x72f   :  { %1233 = vmatprep.subr.bf16.mxu1 %v2742_v61 }
 0x732   :  { %1234 = vmatpush1.bf16.msra.mxu1 %v2740_v62 }
 0x733   :  { %2568 = vmatprep.subr.bf16.mxu1 %v2839_v0 }
 0x7e5   :  { %v1004_v31 = vpop.f32.mrf.mxu1 }
 0x7e6   :  { %v1005_v33 = vadd.f32 %v2272_v18, %v1004_v31 }
 0x7e7   :  { %v2548_v32 = vpop.f32.mrf.mxu1 }
 0x7e8   :  { %v1011_v36 = vmax.f32 %v1005_v33, 0.0 }
 0x7e9   :  { %v1007_v52 = vpop.f32.mrf.mxu1 }
 0x7ea   :  { %v1008_v34 = vadd.f32 %v2272_v18, %v1007_v52  ;;  %v2305_v52 = vld [vmem:[%s3448_s4 + $0x2] sm:$0x3] }
 0x7eb   :  { %v2549_v35 = vpop.f32.mrf.mxu1 }
 0x7ec   :  { %v1012_v37 = vmax.f32 %v1008_v34, 0.0  ;;  %v1169_v35 = vrot.slane %v2305_v52, %v173_v30 }
 0x7ee   :  { %v1013_v38 = vpack.c.bf16 %v1012_v37, %v1011_v36  ;;  %v1173_v37 = vrot.slane %v2305_v52, %v177_v42 }
 0x7f0   :  { %2559 = vmatmul.mubr.msk.bf16.vlgmr.msra.gmra.mxu0 %vm221_vm1, %v1013_v38 }
 0x7f1   :  { %2564 = vmatprep.mubr.msk.bf16.mxu0 %vm2840_vm0, %v2839_v0 }
 0x8b0   :  { %v1092_v40 = vpop.f32.mrf.mxu0 }
 0x8b1   :  { %v1093_v41 = vadd.f32 %v2287_v39, %v1092_v40 }
 0x8b2   :  { %v2560_v43 = vpop.f32.mrf.mxu0 }
 0x8b3   :  { %v1099_v44 = vadd.f32 %v1093_v41, %v925_v21  ;;  %v2295_v21 = vld [vmem:[%s3453_s9 + $0x2] ss:$0 sm:$0xff] }
 0x8b4   :  { %v1095_v45 = vpop.f32.mrf.mxu0 }
 0x8b5   :  { %v1096_v46 = vadd.f32 %v2287_v39, %v1095_v45  ;;  %v1105_v47 = vsel %vm221_vm1, %v1099_v44, 0.0  ;;  %v1113_v48 = vmul.f32 %v1099_v44, %v1099_v44 }
 0x8b6   :  { %1106 = vadd.xlane.f32.xlu0 %v1105_v47  ;;  %v2561_v49 = vpop.f32.mrf.mxu0 }
 0x8b7   :  { %v1100_v50 = vadd.f32 %v1096_v46, %v926_v22  ;;  %v1115_v24 = vsel %vm221_vm1, %v1113_v48, 0.0 }
 0x8b9   :  { %v1108_v25 = vsel %vm221_vm1, %v1100_v50, 0.0  ;;  %v1114_v51 = vmul.f32 %v1100_v50, %v1100_v50 }
 0x8ba   :  { %1116 = vadd.xlane.f32.xlu0 %v1115_v24  ;;  %1109 = vadd.xlane.f32.xlu1 %v1108_v25 }
 0x8bb   :  { %v1118_v53 = vsel %vm221_vm1, %v1114_v51, 0.0 }
 0x8be   :  { %1119 = vadd.xlane.f32.xlu1 %v1118_v53 }
 0x93f   :  { %v1107_v1 = vpop.xlane.xlu0 %1106 }
 0x940   :  { %v1111_v2 = vmul.f32 0.015625, %v1107_v1 }
 0x942   :  { %v1123_v5 = vmul.f32 %v1111_v2, %v1111_v2  ;;  %v1129_v17 = vsub.f32 %v1099_v44, %v1111_v2 }
 0x943   :  { %v1117_v3 = vpop.xlane.xlu0 %1116  ;;  %v1110_v4 = vpop.xlane.xlu1 %1109 }
 0x944   :  { %v1121_v6 = vmul.f32 0.015625, %v1117_v3  ;;  %v1112_v7 = vmul.f32 0.015625, %v1110_v4 }
 0x946   :  { %v1125_v8 = vsub.f32 %v1121_v6, %v1123_v5  ;;  %v1124_v11 = vmul.f32 %v1112_v7, %v1112_v7  ;;  %v1130_v22 = vsub.f32 %v1100_v50, %v1112_v7 }
 0x947   :  { %v1120_v9 = vpop.xlane.xlu1 %1119 }
 0x948   :  { %v1127_v10 = vmax.f32 %v1125_v8, 0.0  ;;  %v1122_v12 = vmul.f32 0.015625, %v1120_v9 }
 0x94a   :  { %v1131_v13 = vadd.f32 1e-05, %v1127_v10  ;;  %v1126_v14 = vsub.f32 %v1122_v12, %v1124_v11 }
 0x94c   :  { %2795 = vrsqrt.f32 %v1131_v13  ;;  %v1128_v15 = vmax.f32 %v1126_v14, 0.0 }
 0x94e   :  { %v1132_v16 = vadd.f32 1e-05, %v1128_v15 }
 0x950   :  { %2797 = vrsqrt.f32 %v1132_v16 }
 0x959   :  { %v2796_v19 = vpop.eup %2795 }
 0x95a   :  { %v1135_v20 = vmul.f32 %v2796_v19, %v1129_v17 }
 0x95c   :  { %v1143_v27 = vmul.f32 %v2295_v21, %v1135_v20 }
 0x95d   :  { %v2798_v23 = vpop.eup %2797 }
 0x95e   :  { %v1136_v26 = vmul.f32 %v2798_v23, %v1130_v22  ;;  %v3217_v31 = vadd.f32 %v2296_v28, %v1143_v27 }
 0x960   :  { %v1144_v18 = vmul.f32 %v2295_v21, %v1136_v26 }
 0x962   :  { %v3219_v32 = vadd.f32 %v2296_v28, %v1144_v18 }
 0x964   :  { %v1153_v33 = vpack.c.bf16 %v3219_v32, %v3217_v31 }
 0x966   :  { %2314 = vmatmul.mubr.msk.bf16.vlgmr.msra.gmra.mxu1 %vm221_vm1, %v1153_v33 }
 0x967   :  { %2570 = vmatprep.mubr.msk.bf16.mxu1 %vm2840_vm0, %v2839_v0 }
 0xa26   :  { %v1253_v34 = vpop.f32.mrf.mxu1 }
 0xa27   :  { %v1254_v39 = vadd.f32 %v1253_v34, %v1169_v35 }
 0xa28   :  { %v1255_v36 = vpop.f32.mrf.mxu1 }
 0xa29   :  { %v1256_v43 = vadd.f32 %v1255_v36, %v1173_v37  ;;  %v1262_v47 = vmul.f32 0.25, %v1254_v39 }
 0xa2a   :  { %v1257_v38 = vpop.f32.mrf.mxu1 }
 0xa2b   :  { %v1258_v40 = vadd.f32 %v1257_v38, %v1169_v35 }
 0xa2c   :  { %v1259_v41 = vpop.f32.mrf.mxu1 }
 0xa2d   :  { %v1263_v44 = vmul.f32 0.25, %v1258_v40  ;;  %v1265_v45 = vpack.c.bf16 %v1258_v40, %v1254_v39  ;;  %v1260_v46 = vadd.f32 %v1259_v41, %v1173_v37 }
 0xa2f   :  { %v3233_v48 = vpack.c.bf16 %v1260_v46, %v1256_v43  ;;  %1387 = vrot.lane.b32.xlu1 %v1265_v45, %s2844_s30  ;;  %1267 = vrot.lane.b32.xlu0 %v1265_v45, %s2842_s28  ;;  %v1264_v30 = vpack.c.bf16 %v1263_v44, %v1262_v47 }
 0xa31   :  { %2569 = vmatpush3.bf16.msra.mxu1 %v3233_v48 }
 0xa32   :  { %2580 = vmatprep.subr.bf16.mxu1 %v2839_v0 }
 0xa33   :  { %1509 = vrot.lane.b32.xlu0 %v1265_v45, %s2845_s14  ;;  %1385 = vrot.lane.b32.xlu1 %v1264_v30, %s2843_s29 }
 0xa37   :  { %1630 = vrot.lane.b32.xlu0 %v1265_v45, %s2847_s16  ;;  %1507 = vrot.lane.b32.xlu1 %v1264_v30, %s2846_s15 }
 0xa3b   :  { %1628 = vrot.lane.b32.xlu1 %v1264_v30, %s2848_s17 }
 0xaa1   :  { %v1268_v29 = vpop.permute.xlu0 %1267  ;;  %v1388_v49 = vpop.permute.xlu1 %1387 }
 0xaa2   :  { %v1273_v42 = vsel %vm277_vm2, %v1268_v29, 0  ;;  %v1393_v50 = vsel %vm277_vm2, %v1388_v49, 0 }
 0xaa3   :  { %2563 = vmatpush3.bf16.xpose.msra.mxu0 %v1273_v42 }
 0xaa4   :  { %2574 = vmatprep.subr.bf16.mxu0 %v2839_v0 }
 0xaa5   :  { %v1510_v24 = vpop.permute.xlu0 %1509  ;;  %v1386_v25 = vpop.permute.xlu1 %1385 }
 0xaa6   :  { %v1515_v51 = vsel %vm277_vm2, %v1510_v24, 0 }
 0xaa9   :  { %v1631_v53 = vpop.permute.xlu0 %1630  ;;  %v1508_v54 = vpop.permute.xlu1 %1507 }
 0xaaa   :  { %2565 = vmatmul.mubr.msk.bf16.vlgmr.msra.gmra.mxu0 %vm277_vm2, %v1264_v30  ;;  %v1636_v55 = vsel %vm277_vm2, %v1631_v53, 0 }
 0xaab   :  { %2575 = vmatpush3.bf16.xpose.msra.mxu0 %v1393_v50  ;;  %2576 = vmatprep.mubr.msk.bf16.mxu0 %vm2840_vm0, %v2839_v0 }
 0xaac   :  { %2586 = vmatprep.subr.bf16.mxu0 %v2839_v0 }
 0xaad   :  { %v1629_v56 = vpop.permute.xlu1 %1628 }
 0xab2   :  { %2577 = vmatmul.mubr.msk.bf16.vlgmr.msra.gmra.mxu0 %vm277_vm2, %v1386_v25 }
 0xab3   :  { %2587 = vmatpush3.bf16.xpose.msra.mxu0 %v1515_v51  ;;  %2588 = vmatprep.mubr.msk.bf16.mxu0 %vm2840_vm0, %v2839_v0 }
 0xab4   :  { %2598 = vmatprep.subr.bf16.mxu0 %v2839_v0 }
 0xaba   :  { %2589 = vmatmul.mubr.msk.bf16.vlgmr.msra.gmra.mxu0 %vm277_vm2, %v1508_v54 }
 0xabb   :  { %2599 = vmatpush3.bf16.xpose.msra.mxu0 %v1636_v55  ;;  %2600 = vmatprep.mubr.msk.bf16.mxu0 %vm2840_vm0, %v2839_v0 }
 0xabc   :  { %2610 = vmatprep.subr.bf16.mxu0 %v2839_v0 }
 0xac2   :  { %2601 = vmatmul.mubr.msk.bf16.vlgmr.msra.gmra.mxu0 %vm277_vm2, %v1629_v56 }
 0xac3   :  { %2618 = vmatprep.mubr.msk.bf16.mxu0 %vm2840_vm0, %v2839_v0 }
 0xb6a   :  { %v1309_v57 = vpop.f32.mrf.mxu0 }
 0xb6b   :  { %v1310_v58 = vadd.f32 %v1309_v57, %v3045_v59 }
 0xb6c   :  { %v2566_v60 = vpop.f32.mrf.mxu0 }
 0xb6d   :  { %v1316_v61 = vsel %vm277_vm2, %v1310_v58, -inf }
 0xb6e   :  { %1317 = vmax.xlane.f32.xlu0 %v1316_v61  ;;  %v1312_v62 = vpop.f32.mrf.mxu0 }
 0xb6f   :  { %v1313_v1 = vadd.f32 %v1312_v62, %v3051_v63 }
 0xb70   :  { %v2567_v2 = vpop.f32.mrf.mxu0 }
 0xb71   :  { %v1319_v3 = vsel %vm277_vm2, %v1313_v1, -inf }
 0xb72   :  { %1320 = vmax.xlane.f32.xlu1 %v1319_v3  ;;  %v1429_v4 = vpop.f32.mrf.mxu0 }
 0xb73   :  { %v3269_v5 = vadd.f32 %v1429_v4, %v3045_v59 }
 0xb74   :  { %v2578_v6 = vpop.f32.mrf.mxu0 }
 0xb75   :  { %v1436_v7 = vsel %vm277_vm2, %v3269_v5, -inf }
 0xb76   :  { %1437 = vmax.xlane.f32.xlu0 %v1436_v7  ;;  %v1432_v8 = vpop.f32.mrf.mxu0 }
 0xb77   :  { %v1433_v9 = vadd.f32 %v1432_v8, %v3051_v63 }
 0xb78   :  { %v2579_v10 = vpop.f32.mrf.mxu0 }
 0xb79   :  { %v1439_v11 = vsel %vm277_vm2, %v1433_v9, -inf }
 0xb7a   :  { %1440 = vmax.xlane.f32.xlu0 %v1439_v11  ;;  %v1551_v12 = vpop.f32.mrf.mxu0 }
 0xb7b   :  { %v1552_v13 = vadd.f32 %v1551_v12, %v3045_v59 }
 0xb7c   :  { %v2590_v14 = vpop.f32.mrf.mxu0 }
 0xb7d   :  { %v1558_v15 = vsel %vm277_vm2, %v1552_v13, -inf }
 0xb7e   :  { %1559 = vmax.xlane.f32.xlu1 %v1558_v15  ;;  %v1554_v16 = vpop.f32.mrf.mxu0 }
 0xb7f   :  { %v1555_v17 = vadd.f32 %v1554_v16, %v3051_v63 }
 0xb80   :  { %v2591_v19 = vpop.f32.mrf.mxu0 }
 0xb81   :  { %v1561_v20 = vsel %vm277_vm2, %v1555_v17, -inf }
 0xb82   :  { %1562 = vmax.xlane.f32.xlu0 %v1561_v20  ;;  %v1672_v21 = vpop.f32.mrf.mxu0 }
 0xb83   :  { %v1673_v22 = vadd.f32 %v1672_v21, %v3045_v59 }
 0xb84   :  { %v2602_v23 = vpop.f32.mrf.mxu0 }
 0xb85   :  { %v1679_v26 = vsel %vm277_vm2, %v1673_v22, -inf }
 0xb86   :  { %1680 = vmax.xlane.f32.xlu1 %v1679_v26  ;;  %v1675_v27 = vpop.f32.mrf.mxu0 }
 0xb87   :  { %v1676_v28 = vadd.f32 %v1675_v27, %v3051_v63 }
 0xb88   :  { %v2603_v18 = vpop.f32.mrf.mxu0 }
 0xb89   :  { %v1682_v33 = vsel %vm277_vm2, %v1676_v28, -inf }
 0xb8a   :  { %1683 = vmax.xlane.f32.xlu0 %v1682_v33 }
 0xbf7   :  { %v1318_v52 = vpop.xlane.xlu0 %1317 }
 0xbf8   :  { %v1322_v34 = vsub.f32 %v1310_v58, %v1318_v52 }
 0xbfa   :  { %v1324_v35 = vmul.f32 1.442695, %v1322_v34 }
 0xbfb   :  { %v1321_v36 = vpop.xlane.xlu1 %1320 }
 0xbfc   :  { %2799 = vpow2.f32 %v1324_v35  ;;  %v1323_v37 = vsub.f32 %v1313_v1, %v1321_v36 }
 0xbfe   :  { %v1326_v38 = vmul.f32 1.442695, %v1323_v37 }
 0xbff   :  { %v1438_v39 = vpop.xlane.xlu0 %1437 }
 0xc00   :  { %2801 = vpow2.f32 %v1326_v38  ;;  %v1442_v55 = vsub.f32 %v3269_v5, %v1438_v39 }
 0xc02   :  { %v1444_v57 = vmul.f32 1.442695, %v1442_v55 }
 0xc03   :  { %v1441_v59 = vpop.xlane.xlu0 %1440 }
 0xc04   :  { %v1443_v40 = vsub.f32 %v1433_v9, %v1441_v59 }
 0xc06   :  { %v1446_v41 = vmul.f32 1.442695, %v1443_v40 }
 0xc07   :  { %v1560_v56 = vpop.xlane.xlu1 %1559 }
 0xc08   :  { %2803 = vpow2.f32 %v1446_v41  ;;  %v1564_v58 = vsub.f32 %v1552_v13, %v1560_v56 }
 0xc09   :  { %v2800_v43 = vpop.eup %2799 }
 0xc0a   :  { %v1328_v63 = vsel %vm277_vm2, %v2800_v43, 0.0  ;;  %v1566_v61 = vmul.f32 1.442695, %v1564_v58 }
 0xc0b   :  { %v1563_v44 = vpop.xlane.xlu0 %1562  ;;  %1329 = vadd.xlane.f32.xlu1 %v1328_v63 }
 0xc0c   :  { %v1565_v45 = vsub.f32 %v1555_v17, %v1563_v44 }
 0xc0d   :  { %v2802_v46 = vpop.eup %2801 }
 0xc0e   :  { %v1568_v47 = vmul.f32 1.442695, %v1565_v45  ;;  %v1331_v30 = vsel %vm277_vm2, %v2802_v46, 0.0 }
 0xc0f   :  { %1332 = vadd.xlane.f32.xlu0 %v1331_v30  ;;  %v1681_v60 = vpop.xlane.xlu1 %1680 }
 0xc10   :  { %2805 = vpow2.f32 %v1568_v47  ;;  %v1685_v62 = vsub.f32 %v1673_v22, %v1681_v60 }
 0xc12   :  { %v1687_v1 = vmul.f32 1.442695, %v1685_v62 }
 0xc13   :  { %v1684_v29 = vpop.xlane.xlu0 %1683 }
 0xc14   :  { %v1686_v42 = vsub.f32 %v1676_v28, %v1684_v29  ;;  %v2744_v29 = vld [vmem:[%s3450_s5 + $0x30] sm:$0xff]  }
 0xc15   :  { %v3285_v49 = vpop.eup %2803 }
 0xc16   :  { %v1689_v50 = vmul.f32 1.442695, %v1686_v42  ;;  %v1451_v24 = vsel %vm277_vm2, %v3285_v49, 0.0 }
 0xc17   :  { %1452 = vadd.xlane.f32.xlu0 %v1451_v24 }
 0xc18   :  { %2807 = vpow2.f32 %v1689_v50  ;;  %v2745_v50 = vld [vmem:[%s3450_s5 + $0x28] sm:$0xff]  }
 0xc19   :  { %2809 = vpow2.f32 %v1444_v57 }
 0xc1a   :  { %2811 = vpow2.f32 %v1566_v61 }
 0xc1b   :  { %2813 = vpow2.f32 %v1687_v1 }
 0xc1c   :  { %1460 = vrot.lane.b32.xlu1 %v3233_v48, %s2843_s29 }
 0xc1d   :  { %v3291_v25 = vpop.eup %2805 }
 0xc1e   :  { %v1573_v51 = vsel %vm277_vm2, %v3291_v25, 0.0 }
 0xc1f   :  { %1574 = vadd.xlane.f32.xlu0 %v1573_v51 }
 0xc25   :  { %v3295_v53 = vpop.eup %2807 }
 0xc26   :  { %v1694_v54 = vsel %vm277_vm2, %v3295_v53, 0.0  ;;  %v2810_v2 = vpop.eup %2809 }
 0xc27   :  { %1695 = vadd.xlane.f32.xlu0 %v1694_v54  ;;  %v1448_v3 = vsel %vm277_vm2, %v2810_v2, 0.0  ;;  %v2812_v4 = vpop.eup %2811 }
 0xc28   :  { %v1570_v5 = vsel %vm277_vm2, %v2812_v4, 0.0  ;;  %v2814_v6 = vpop.eup %2813 }
 0xc29   :  { %v1691_v7 = vsel %vm277_vm2, %v2814_v6, 0.0 }
 0xc3d   :  { %1581 = vrot.lane.b32.xlu0 %v3233_v48, %s2846_s15 }
 0xc40   :  { %1449 = vadd.xlane.f32.xlu1 %v1448_v3 }
 0xc44   :  { %1571 = vadd.xlane.f32.xlu1 %v1570_v5 }
 0xc48   :  { %1692 = vadd.xlane.f32.xlu1 %v1691_v7 }
 0xc59   :  { %1702 = vrot.lane.b32.xlu1 %v3233_v48, %s2848_s17 }
 0xc94   :  { %v1330_v8 = vpop.xlane.xlu1 %1329 }
 0xc95   :  { %2815 = vrcp.f32 %v1330_v8 }
 0xc98   :  { %v1333_v9 = vpop.xlane.xlu0 %1332  ;;  %v1461_v15 = vpop.permute.xlu1 %1460 }
 0xc99   :  { %2817 = vrcp.f32 %v1333_v9 }
 0xca0   :  { %v1453_v16 = vpop.xlane.xlu0 %1452 }
 0xca1   :  { %2819 = vrcp.f32 %v1453_v16 }
 0xca2   :  { %v2816_v10 = vpop.eup %2815 }
 0xca3   :  { %v1336_v12 = vmul.f32 %v2816_v10, %v2800_v43 }
 0xca6   :  { %v2818_v11 = vpop.eup %2817 }
 0xca7   :  { %v1337_v13 = vmul.f32 %v2818_v11, %v2802_v46  ;;  %v2743_v46 = vld [vmem:[%s3450_s5 + $0x38] sm:$0xff]  }
 0xca8   :  { %v1575_v17 = vpop.xlane.xlu0 %1574  ;;  %2611 = vmatpush3.bf16.msra.mxu0 %v2743_v46 }
 0xca9   :  { %v1338_v14 = vpack.c.bf16 %v1337_v13, %v1336_v12  ;;  %2612 = vmatprep.subr.bf16.mxu0 %v2839_v0 }
 0xcab   :  { %2571 = vmatmul.mubr.msk.bf16.vlgmr.msra.gmra.mxu1 %vm277_vm2, %v1338_v14 }
 0xcac   :  { %2581 = vmatpush3.bf16.msra.mxu1 %v1461_v15  ;;  %2582 = vmatprep.mubr.msk.bf16.mxu1 %vm2840_vm0, %v2839_v0 }
 0xcad   :  { %2592 = vmatprep.subr.bf16.mxu1 %v2839_v0  ;;  %2613 = vmatpush3.bf16.msra.mxu0 %v2744_v29 }
 0xcae   :  { %v2820_v21 = vpop.eup %2819  ;;  %2614 = vmatprep.subr.bf16.mxu0 %v2839_v0 }
 0xcaf   :  { %v1457_v27 = vmul.f32 %v2820_v21, %v3285_v49 }
 0xcb0   :  { %v1696_v22 = vpop.xlane.xlu0 %1695 }
 0xcb1   :  { %2615 = vmatpush3.bf16.msra.mxu0 %v2745_v50 }
 0xcb2   :  { %2616 = vmatprep.subr.bf16.mxu0 %v2839_v0 }
 0xcb4   :  { %v1582_v33 = vpop.permute.xlu0 %1581 }
 0xcc9   :  { %v1450_v48 = vpop.xlane.xlu1 %1449 }
 0xcca   :  { %2821 = vrcp.f32 %v1450_v48  ;;  %v2332_v48 = vld [vmem:[%s3451_s6 + $0x1] ss:$0 sm:$0xff] }
 0xccd   :  { %v1572_v19 = vpop.xlane.xlu1 %1571 }
 0xcce   :  { %2823 = vrcp.f32 %v1572_v19 }
 0xccf   :  { %2825 = vrcp.f32 %v1575_v17 }
 0xcd1   :  { %v1693_v20 = vpop.xlane.xlu1 %1692 }
 0xcd2   :  { %2827 = vrcp.f32 %v1693_v20 }
 0xcd3   :  { %2829 = vrcp.f32 %v1696_v22 }
 0xcd5   :  { %v1703_v38 = vpop.permute.xlu1 %1702 }
 0xcd7   :  { %v2822_v23 = vpop.eup %2821 }
 0xcd8   :  { %v1456_v26 = vmul.f32 %v2822_v23, %v2810_v2 }
 0xcda   :  { %v1458_v28 = vpack.c.bf16 %v1457_v27, %v1456_v26 }
 0xcdb   :  { %v2824_v18 = vpop.eup %2823 }
 0xcdc   :  { %2583 = vmatmul.mubr.msk.bf16.vlgmr.msra.gmra.mxu1 %vm277_vm2, %v1458_v28  ;;  %v2826_v52 = vpop.eup %2825  ;;  %v1578_v34 = vmul.f32 %v2824_v18, %v2812_v4 }
 0xcdd   :  { %2593 = vmatpush3.bf16.msra.mxu1 %v1582_v33  ;;  %2594 = vmatprep.mubr.msk.bf16.mxu1 %vm2840_vm0, %v2839_v0  ;;  %v1579_v35 = vmul.f32 %v2826_v52, %v3291_v25 }
 0xcde   :  { %2604 = vmatprep.subr.bf16.mxu1 %v2839_v0 }
 0xcdf   :  { %v1580_v36 = vpack.c.bf16 %v1579_v35, %v1578_v34  ;;  %v2828_v37 = vpop.eup %2827 }
 0xce0   :  { %v2830_v39 = vpop.eup %2829  ;;  %v1699_v59 = vmul.f32 %v2828_v37, %v2814_v6  ;;  %v2750_v37 = vld [vmem:[%s3452_s7 + $0x40] sm:$0xff]  }
 0xce1   :  { %v1700_v40 = vmul.f32 %v2830_v39, %v3295_v53  ;;  %v2746_v53 = vld [vmem:[%s3450_s5 + $0x20] sm:$0xff]  }
 0xce2   :  { %2617 = vmatpush3.bf16.msra.mxu0 %v2746_v53 }
 0xce3   :  { %v1701_v41 = vpack.c.bf16 %v1700_v40, %v1699_v59  ;;  %2634 = vmatprep.subr.bf16.mxu0 %v2839_v0 }
 0xce4   :  { %2595 = vmatmul.mubr.msk.bf16.vlgmr.msra.gmra.mxu1 %vm277_vm2, %v1580_v36  ;;  %v2748_v36 = vld [vmem:[%s3452_s7 + $0x50] sm:$0xff]  }
 0xce5   :  { %2605 = vmatpush3.bf16.msra.mxu1 %v1703_v38  ;;  %2606 = vmatprep.mubr.msk.bf16.mxu1 %vm2840_vm0, %v2839_v0  ;;  %v2751_v38 = vld [vmem:[%s3452_s7 + $0x78] sm:$0xff]  }
 0xce6   :  { %2622 = vmatprep.subr.bf16.mxu1 %v2839_v0 }
 0xcec   :  { %2607 = vmatmul.mubr.msk.bf16.vlgmr.msra.gmra.mxu1 %vm277_vm2, %v1701_v41 }
 0xced   :  { %2630 = vmatprep.mubr.msk.bf16.mxu1 %vm2840_vm0, %v2839_v0 }
 0xd6b   :  { %v1377_v43 = vpop.f32.mrf.mxu1 }
 0xd6d   :  { %v2572_v63 = vpop.f32.mrf.mxu1 }
 0xd6f   :  { %v1380_v44 = vpop.f32.mrf.mxu1 }
 0xd71   :  { %v2573_v45 = vpop.f32.mrf.mxu1 }
 0xd9c   :  { %v1500_v47 = vpop.f32.mrf.mxu1 }
 0xd9e   :  { %v2584_v30 = vpop.f32.mrf.mxu1 }
 0xda0   :  { %v1503_v42 = vpop.f32.mrf.mxu1 }
 0xda1   :  { %v2683_v49 = vpack.i.bf16 %v1503_v42, %v1500_v47 }
 0xda2   :  { %v2585_v24 = vpop.f32.mrf.mxu1 }
 0xda3   :  { %2684 = vrot.lane.b32.xlu1 %v2683_v49, %s2847_s16 }
 0xda4   :  { %v1621_v25 = vpop.f32.mrf.mxu1 }
 0xda6   :  { %v2596_v51 = vpop.f32.mrf.mxu1 }
 0xda8   :  { %v1624_v54 = vpop.f32.mrf.mxu1 }
 0xda9   :  { %v2688_v55 = vpack.i.bf16 %v1624_v54, %v1621_v25  ;;  %v2340_v54 = vld [vmem:[%s3453_s9 + $0x4] ss:$0 sm:$0xff] }
 0xdaa   :  { %v2597_v56 = vpop.f32.mrf.mxu1 }
 0xdab   :  { %2689 = vrot.lane.b32.xlu0 %v2688_v55, %s2845_s14 }
 0xdac   :  { %v1742_v57 = vpop.f32.mrf.mxu1 }
 0xdae   :  { %v2608_v58 = vpop.f32.mrf.mxu1 }
 0xdb0   :  { %v1745_v60 = vpop.f32.mrf.mxu1 }
 0xdb1   :  { %v2693_v61 = vpack.i.bf16 %v1745_v60, %v1742_v57  ;;  %v2341_v60 = vld [vmem:[%s3453_s9 + $0x5] ss:$0 sm:$0xff] }
 0xdb2   :  { %v2609_v62 = vpop.f32.mrf.mxu1 }
 0xdb3   :  { %2694 = vrot.lane.b32.xlu1 %v2693_v61, %s2844_s30 }
 0xe15   :  { %v2685_v1 = vpop.permute.xlu1 %2684 }
 0xe16   :  { %v2687_v3 = vunpack.i.h.bf16 %v2685_v1  ;;  %v2686_v4 = vunpack.i.l.bf16 %v2685_v1 }
 0xe18   :  { %v1774_v8 = vsel %vm277_vm2, %v1380_v44, %v2687_v3  ;;  %v1773_v9 = vsel %vm277_vm2, %v1377_v43, %v2686_v4  ;;  %v2752_v3 = vld [vmem:[%s3452_s7 + $0x70] sm:$0xff]   ;;  %v2753_v4 = vld [vmem:[%s3452_s7 + $0x68] sm:$0xff]  }
 0xe1d   :  { %v2690_v2 = vpop.permute.xlu0 %2689 }
 0xe1e   :  { %v2692_v5 = vunpack.i.h.bf16 %v2690_v2  ;;  %v2691_v6 = vunpack.i.l.bf16 %v2690_v2 }
 0xe20   :  { %v1776_v12 = vsel %vm784_vm3, %v1774_v8, %v2692_v5  ;;  %v1775_v13 = vsel %vm784_vm3, %v1773_v9, %v2691_v6  ;;  %v2754_v5 = vld [vmem:[%s3452_s7 + $0x60] sm:$0xff]  }
 0xe21   :  { %v2351_v6 = vld [vmem:[%s3454_s8 + $0x2] ss:$0 sm:$0xff] }
 0xe25   :  { %v2695_v7 = vpop.permute.xlu1 %2694 }
 0xe26   :  { %v2697_v10 = vunpack.i.h.bf16 %v2695_v7  ;;  %v2696_v11 = vunpack.i.l.bf16 %v2695_v7 }
 0xe28   :  { %v1778_v14 = vsel %vm787_vm4, %v1776_v12, %v2697_v10  ;;  %v1777_v15 = vsel %vm787_vm4, %v1775_v13, %v2696_v11 }
 0xe29   :  { %v1779_v16 = vpack.c.bf16 %v1778_v14, %v1777_v15 }
 0xe2b   :  { %2619 = vmatmul.mubr.msk.bf16.vlgmr.msra.gmra.mxu0 %vm221_vm1, %v1779_v16  ;;  %v2366_v16 = vld [vmem:[%s3454_s8 + $0x3] ss:$0 sm:$0xff] }
 0xe2c   :  { %2642 = vmatprep.mubr.msk.bf16.mxu0 %vm2840_vm0, %v2839_v0  ;;  %2635 = vmatpush3.bf16.msra.mxu0 %v2751_v38 }
 0xe2d   :  { %2636 = vmatprep.subr.bf16.mxu0 %v2839_v0 }
 0xe30   :  { %2637 = vmatpush3.bf16.msra.mxu0 %v2752_v3 }
 0xe31   :  { %2638 = vmatprep.subr.bf16.mxu0 %v2839_v0 }
 0xe34   :  { %2639 = vmatpush3.bf16.msra.mxu0 %v2753_v4 }
 0xe35   :  { %2640 = vmatprep.subr.bf16.mxu0 %v2839_v0 }
 0xe38   :  { %2641 = vmatpush3.bf16.msra.mxu0 %v2754_v5 }
 0xeeb   :  { %v1858_v17 = vpop.f32.mrf.mxu0 }
 0xeec   :  { %v1859_v19 = vadd.f32 %v2332_v48, %v1858_v17 }
 0xeed   :  { %v2620_v20 = vpop.f32.mrf.mxu0 }
 0xeee   :  { %v1865_v21 = vadd.f32 %v1859_v19, %v3217_v31  ;;  %v2747_v31 = vld [vmem:[%s3452_s7 + $0x58] sm:$0xff]  }
 0xeef   :  { %v1861_v22 = vpop.f32.mrf.mxu0  ;;  %2623 = vmatpush3.bf16.msra.mxu1 %v2747_v31  ;;  %v2756_v31 = vld [vmem:[%s3455_s10 + $0x10] sm:$0xff]  }
 0xef0   :  { %v1862_v23 = vadd.f32 %v2332_v48, %v1861_v22  ;;  %v1871_v26 = vsel %vm221_vm1, %v1865_v21, 0.0  ;;  %v1879_v27 = vmul.f32 %v1865_v21, %v1865_v21  ;;  %2624 = vmatprep.subr.bf16.mxu1 %v2839_v0 }
 0xef1   :  { %1872 = vadd.xlane.f32.xlu0 %v1871_v26  ;;  %v2621_v28 = vpop.f32.mrf.mxu0 }
 0xef2   :  { %v1866_v18 = vadd.f32 %v1862_v23, %v3219_v32  ;;  %v1881_v33 = vsel %vm221_vm1, %v1879_v27, 0.0  ;;  %v2749_v32 = vld [vmem:[%s3452_s7 + $0x48] sm:$0xff]  }
 0xef3   :  { %2625 = vmatpush3.bf16.msra.mxu1 %v2748_v36  ;;  %v2757_v36 = vld [vmem:[%s3455_s10 + $0x8] sm:$0xff]  }
 0xef4   :  { %v1874_v52 = vsel %vm221_vm1, %v1866_v18, 0.0  ;;  %v1880_v34 = vmul.f32 %v1866_v18, %v1866_v18  ;;  %2626 = vmatprep.subr.bf16.mxu1 %v2839_v0 }
 0xef5   :  { %1882 = vadd.xlane.f32.xlu0 %v1881_v33  ;;  %1875 = vadd.xlane.f32.xlu1 %v1874_v52 }
 0xef6   :  { %v1884_v35 = vsel %vm221_vm1, %v1880_v34, 0.0 }
 0xef7   :  { %2627 = vmatpush3.bf16.msra.mxu1 %v2749_v32  ;;  %v2758_v32 = vld [vmem:[%s3455_s10] sm:$0xff]  }
 0xef8   :  { %2628 = vmatprep.subr.bf16.mxu1 %v2839_v0 }
 0xef9   :  { %1885 = vadd.xlane.f32.xlu0 %v1884_v35  ;;  %v2755_v35 = vld [vmem:[%s3455_s10 + $0x18] sm:$0xff]  }
 0xefb   :  { %2629 = vmatpush3.bf16.msra.mxu1 %v2750_v37 }
 0xefc   :  { %2646 = vmatprep.subr.bf16.mxu1 %v2839_v0 }
 0xf7a   :  { %v1873_v39 = vpop.xlane.xlu0 %1872 }
 0xf7b   :  { %v1877_v59 = vmul.f32 0.015625, %v1873_v39 }
 0xf7d   :  { %v1889_v43 = vmul.f32 %v1877_v59, %v1877_v59  ;;  %v1895_v25 = vsub.f32 %v1865_v21, %v1877_v59 }
 0xf7e   :  { %v1883_v40 = vpop.xlane.xlu0 %1882  ;;  %v1876_v41 = vpop.xlane.xlu1 %1875 }
 0xf7f   :  { %v1887_v63 = vmul.f32 0.015625, %v1883_v40  ;;  %v1878_v44 = vmul.f32 0.015625, %v1876_v41 }
 0xf81   :  { %v1891_v45 = vsub.f32 %v1887_v63, %v1889_v43  ;;  %v1890_v30 = vmul.f32 %v1878_v44, %v1878_v44  ;;  %v1896_v55 = vsub.f32 %v1866_v18, %v1878_v44 }
 0xf82   :  { %v1886_v46 = vpop.xlane.xlu0 %1885 }
 0xf83   :  { %v1893_v47 = vmax.f32 %v1891_v45, 0.0  ;;  %v1888_v29 = vmul.f32 0.015625, %v1886_v46 }
 0xf85   :  { %v1897_v42 = vadd.f32 1e-05, %v1893_v47  ;;  %v1892_v49 = vsub.f32 %v1888_v29, %v1890_v30 }
 0xf87   :  { %2831 = vrsqrt.f32 %v1897_v42  ;;  %v1894_v50 = vmax.f32 %v1892_v49, 0.0 }
 0xf89   :  { %v1898_v24 = vadd.f32 1e-05, %v1894_v50 }
 0xf8b   :  { %2833 = vrsqrt.f32 %v1898_v24 }
 0xf94   :  { %v2832_v51 = vpop.eup %2831 }
 0xf95   :  { %v1901_v53 = vmul.f32 %v2832_v51, %v1895_v25  ;;  %v2374_v25 = vld [vmem:[%s3453_s9 + $0x6] ss:$0 sm:$0xff] }
 0xf97   :  { %v1909_v58 = vmul.f32 %v2340_v54, %v1901_v53 }
 0xf98   :  { %v2834_v56 = vpop.eup %2833 }
 0xf99   :  { %v1902_v57 = vmul.f32 %v2834_v56, %v1896_v55  ;;  %v1917_v62 = vadd.f32 %v2341_v60, %v1909_v58  ;;  %v2375_v56 = vld [vmem:[%s3453_s9 + $0x7] ss:$0 sm:$0xff] }
 0xf9b   :  { %v1910_v61 = vmul.f32 %v2340_v54, %v1902_v57 }
 0xf9d   :  { %v1918_v1 = vadd.f32 %v2341_v60, %v1910_v61 }
 0xf9f   :  { %v1919_v2 = vpack.c.bf16 %v1918_v1, %v1917_v62 }
 0xfa1   :  { %2631 = vmatmul.mubr.msk.bf16.vlgmr.msra.gmra.mxu1 %vm221_vm1, %v1919_v2 }
 0xfa2   :  { %2654 = vmatprep.mubr.msk.bf16.mxu1 %vm2840_vm0, %v2839_v0  ;;  %2647 = vmatpush3.bf16.msra.mxu1 %v2755_v35 }
 0xfa3   :  { %2648 = vmatprep.subr.bf16.mxu1 %v2839_v0 }
 0xfa6   :  { %2649 = vmatpush3.bf16.msra.mxu1 %v2756_v31 }
 0xfa7   :  { %2650 = vmatprep.subr.bf16.mxu1 %v2839_v0 }
 0xfaa   :  { %2651 = vmatpush3.bf16.msra.mxu1 %v2757_v36 }
 0xfab   :  { %2652 = vmatprep.subr.bf16.mxu1 %v2839_v0 }
 0xfae   :  { %2653 = vmatpush3.bf16.msra.mxu1 %v2758_v32 }
0x1061   :  { %v1998_v7 = vpop.f32.mrf.mxu1 }
0x1062   :  { %v1999_v9 = vadd.f32 %v2351_v6, %v1998_v7 }
0x1063   :  { %v2632_v8 = vpop.f32.mrf.mxu1 }
0x1064   :  { %v2005_v13 = vmax.f32 %v1999_v9, 0.0 }
0x1065   :  { %v2001_v10 = vpop.f32.mrf.mxu1 }
0x1066   :  { %v2002_v11 = vadd.f32 %v2351_v6, %v2001_v10 }
0x1067   :  { %v2633_v12 = vpop.f32.mrf.mxu1 }
0x1068   :  { %v2006_v14 = vmax.f32 %v2002_v11, 0.0 }
0x106a   :  { %v2007_v15 = vpack.c.bf16 %v2006_v14, %v2005_v13 }
0x106c   :  { %2643 = vmatmul.mubr.msk.bf16.vlgmr.msra.gmra.mxu0 %vm221_vm1, %v2007_v15 }
0x112c   :  { %v2086_v48 = vpop.f32.mrf.mxu0 }
0x112d   :  { %v2087_v17 = vadd.f32 %v2366_v16, %v2086_v48 }
0x112e   :  { %v2644_v19 = vpop.f32.mrf.mxu0 }
0x112f   :  { %v2093_v20 = vadd.f32 %v2087_v17, %v1917_v62  ;;  %v2376_v62 = vld [vmem:[%s3456_s11] ss:$0 sm:$0xff] }
0x1130   :  { %v2089_v21 = vpop.f32.mrf.mxu0 }
0x1131   :  { %v2090_v22 = vadd.f32 %v2366_v16, %v2089_v21  ;;  %v2099_v23 = vsel %vm221_vm1, %v2093_v20, 0.0  ;;  %v2107_v26 = vmul.f32 %v2093_v20, %v2093_v20 }
0x1132   :  { %2100 = vadd.xlane.f32.xlu1 %v2099_v23  ;;  %v2645_v27 = vpop.f32.mrf.mxu0 }
0x1133   :  { %v2094_v28 = vadd.f32 %v2090_v22, %v1918_v1  ;;  %v2109_v18 = vsel %vm221_vm1, %v2107_v26, 0.0 }
0x1135   :  { %v2102_v33 = vsel %vm221_vm1, %v2094_v28, 0.0  ;;  %v2108_v52 = vmul.f32 %v2094_v28, %v2094_v28 }
0x1136   :  { %2110 = vadd.xlane.f32.xlu1 %v2109_v18  ;;  %2103 = vadd.xlane.f32.xlu0 %v2102_v33 }
0x1137   :  { %v2112_v34 = vsel %vm221_vm1, %v2108_v52, 0.0 }
0x113a   :  { %2113 = vadd.xlane.f32.xlu0 %v2112_v34 }
0x11bb   :  { %v2101_v37 = vpop.xlane.xlu1 %2100 }
0x11bc   :  { %v2105_v38 = vmul.f32 0.015625, %v2101_v37 }
0x11be   :  { %v2117_v40 = vmul.f32 %v2105_v38, %v2105_v38  ;;  %v2123_v0 = vsub.f32 %v2093_v20, %v2105_v38 }
0x11bf   :  { %v2111_v39 = vpop.xlane.xlu1 %2110  ;;  %v2104_v59 = vpop.xlane.xlu0 %2103 }
0x11c0   :  { %v2115_v41 = vmul.f32 0.015625, %v2111_v39  ;;  %v2106_v43 = vmul.f32 0.015625, %v2104_v59 }
0x11c2   :  { %v2119_v63 = vsub.f32 %v2115_v41, %v2117_v40  ;;  %v2118_v46 = vmul.f32 %v2106_v43, %v2106_v43  ;;  %v2124_v51 = vsub.f32 %v2094_v28, %v2106_v43 }
0x11c3   :  { %v2114_v44 = vpop.xlane.xlu0 %2113 }
0x11c4   :  { %v2121_v45 = vmax.f32 %v2119_v63, 0.0  ;;  %v2116_v47 = vmul.f32 0.015625, %v2114_v44 }
0x11c6   :  { %v2125_v30 = vadd.f32 1e-05, %v2121_v45  ;;  %v2120_v29 = vsub.f32 %v2116_v47, %v2118_v46 }
0x11c8   :  { %2835 = vrsqrt.f32 %v2125_v30  ;;  %v2122_v42 = vmax.f32 %v2120_v29, 0.0 }
0x11ca   :  { %v2126_v49 = vadd.f32 1e-05, %v2122_v42 }
0x11cc   :  { %2837 = vrsqrt.f32 %v2126_v49 }
0x11d5   :  { %v2836_v50 = vpop.eup %2835 }
0x11d6   :  { %v2129_v24 = vmul.f32 %v2836_v50, %v2123_v0 }
0x11d8   :  { %v2137_v55 = vmul.f32 %v2374_v25, %v2129_v24 }
0x11d9   :  { %v2838_v53 = vpop.eup %2837 }
0x11da   :  { %v2130_v54 = vmul.f32 %v2838_v53, %v2124_v51  ;;  %v2145_v58 = vadd.f32 %v2375_v56, %v2137_v55 }
0x11dc   :  { %v2138_v57 = vmul.f32 %v2374_v25, %v2130_v54 }
0x11de   :  { %v2146_v60 = vadd.f32 %v2375_v56, %v2138_v57 }
0x11e0   :  { %v2147_v61 = vpack.c.bf16 %v2146_v60, %v2145_v58 }
0x11e2   :  { %2655 = vmatmul.mubr.msk.bf16.vlgmr.msra.gmra.mxu1 %vm221_vm1, %v2147_v61 }
0x12a2   :  { %v2224_v1 = vpop.f32.mrf.mxu1 }
0x12a3   :  { %v2225_v2 = vadd.f32 %v2376_v62, %v2224_v1 }
0x12a4   :  { %v2656_v3 = vpop.f32.mrf.mxu1 }
0x12a5   :  { %2231 = vst [vmem:[%s3457_s13] sm:$0xff] %v2225_v2 }
0x12a6   :  { %v2227_v4 = vpop.f32.mrf.mxu1 }
0x12a7   :  { %v2228_v5 = vadd.f32 %v2376_v62, %v2227_v4 }
0x12a8   :  { %v2657_v6 = vpop.f32.mrf.mxu1 }
0x12a9   :  { %2232 = vst [vmem:[%s3457_s13 + $0x8] sm:$0xff] %v2228_v5 }

</bundles_post_ra>
